<compile_context>
chip_gen: v7x
topology: tpu7x:2x2x1
jax: 0.10.0
libtpu: 0.0.40
codegen_flags: <defaults>
</compile_context>

<pallas_src>
import functools
import math

import jax
import jax.numpy as jnp
from jax.experimental import pallas as pl
from jax.experimental.pallas import tpu as pltpu

# ----------------------------- model config (small) -------------------------
VOCAB_SIZE = 128
MAX_POS = 64
TYPE_VOCAB = 2
HIDDEN = 32
NUM_LAYERS = 2
NUM_HEADS = 2
HEAD_DIM = HIDDEN // NUM_HEADS
INTERMEDIATE = 64
NUM_CLASSES = 2
LN_EPS = 1e-12

MXU_DTYPE = jnp.bfloat16  # MXU input dtype; accumulation & elementwise stay f32

_VMEM = pl.BlockSpec(memory_space=pltpu.MemorySpace.VMEM)

# Rows of the packed "small params" blob (shape (_N_SMALL_ROWS, HIDDEN)).
_ROW_EMB_LN_G = 0
_ROW_EMB_LN_B = 1
_ROWS_PER_LAYER = 6          # ao_b, ao_ln_g, ao_ln_b, o_b, o_ln_g, o_ln_b
_ROW_LAYER_BASE = 2
_ROW_POOL_B = _ROW_LAYER_BASE + NUM_LAYERS * _ROWS_PER_LAYER
_ROW_CLS_B = _ROW_POOL_B + 1
_N_SMALL_ROWS = _ROW_CLS_B + 1


# ----------------------------- in-kernel helpers ----------------------------
def _mm(a, b):
    """MXU matmul: bf16 inputs, f32 accumulation."""
    return jnp.dot(a.astype(MXU_DTYPE), b.astype(MXU_DTYPE),
                   preferred_element_type=jnp.float32)


def _mm_nt(a, b):
    """a @ b.T without an explicit transpose (contract both last dims)."""
    return jax.lax.dot_general(
        a.astype(MXU_DTYPE), b.astype(MXU_DTYPE),
        dimension_numbers=(((1,), (1,)), ((), ())),
        preferred_element_type=jnp.float32)


def _layernorm(x, gamma, beta, residual=None):
    """LayerNorm over the last axis (optional residual add), f32 math."""
    if residual is not None:
        x = x + residual
    mu = jnp.mean(x, axis=-1, keepdims=True)
    xc = x - mu
    var = jnp.mean(xc * xc, axis=-1, keepdims=True)
    return xc * jax.lax.rsqrt(var + LN_EPS) * gamma + beta


# ----------------------------- fused forward kernel -------------------------
def _bert_fused_kernel(
    ids_ref, mask_ref,
    word_ref, pos_tok_ref,
    qkv_w_ref, qkv_b_ref, ao_w_ref,
    i_w_ref, i_b_ref, o_w_ref,
    pool_w_ref, cls_w_ref, small_ref,
    logits_ref,
    *, batch, seq):
    BS = batch * seq

    # ---- embeddings: one-hot MXU gather + pre-tiled (pos + token-type-0) ----
    ids = ids_ref[...]                                           # (BS, 1) int32
    vocab_iota = jax.lax.broadcasted_iota(jnp.int32, (BS, VOCAB_SIZE), 1)
    one_hot = (ids == vocab_iota).astype(jnp.float32)            # (BS, VOCAB)
    emb = _mm(one_hot, word_ref[...]) + pos_tok_ref[...]         # (BS, H)
    x = _layernorm(emb,
                   small_ref[_ROW_EMB_LN_G:_ROW_EMB_LN_G + 1, :],
                   small_ref[_ROW_EMB_LN_B:_ROW_EMB_LN_B + 1, :])

    # ---- fused additive mask: block-diagonal over batch + key padding ------
    # add_mask[r, c] = 0 if (r, c) in the same batch element AND key c is
    # attended, else -1e9.  Lets attention run as ONE (BS,BS) matmul per head.
    inv_seq = 1.0 / float(seq)
    row_blk = jnp.floor(
        (jax.lax.broadcasted_iota(jnp.int32, (BS, BS), 0).astype(jnp.float32)
         + 0.5) * inv_seq)
    col_blk = jnp.floor(
        (jax.lax.broadcasted_iota(jnp.int32, (BS, BS), 1).astype(jnp.float32)
         + 0.5) * inv_seq)
    key_ok = mask_ref[...] > 0.5                                 # (1, BS)
    valid = jnp.logical_and(row_blk == col_blk, key_ok)          # (BS, BS)
    add_mask = jnp.where(valid, jnp.float32(0.0), jnp.float32(-1e9))

    # ---- encoder layers (statically unrolled; per-layer weights via ref[l]) -
    for l in range(NUM_LAYERS):
        base = _ROW_LAYER_BASE + l * _ROWS_PER_LAYER
        # fused QKV projection (1/sqrt(dH) scale pre-folded into the Q columns)
        qkv = _mm(x, qkv_w_ref[l]) + qkv_b_ref[l]                # (BS, 3H)

        ctx_heads = []
        for h in range(NUM_HEADS):
            qc = h * HEAD_DIM
            kc = HIDDEN + h * HEAD_DIM
            vc = 2 * HIDDEN + h * HEAD_DIM
            q_h = qkv[:, qc:qc + HEAD_DIM]                       # (BS, dH)
            k_h = qkv[:, kc:kc + HEAD_DIM]                       # (BS, dH)
            v_h = qkv[:, vc:vc + HEAD_DIM]                       # (BS, dH)
            # one scores matmul over the whole batch; cross-batch pairs and
            # padded keys get -1e9 (exp underflows to exactly 0).
            s = _mm_nt(q_h, k_h) + add_mask                      # (BS, BS)
            s = s - jnp.max(s, axis=-1, keepdims=True)
            p = jnp.exp(s)
            p = p * pl.reciprocal(jnp.sum(p, axis=-1, keepdims=True),
                                  approx=True)
            ctx_heads.append(_mm(p, v_h))                        # (BS, dH)
        ctx = jnp.concatenate(ctx_heads, axis=-1)                # (BS, H)

        attn_out = _mm(ctx, ao_w_ref[l]) + small_ref[base + 0:base + 1, :]
        x = _layernorm(attn_out,
                       small_ref[base + 1:base + 2, :],
                       small_ref[base + 2:base + 3, :],
                       residual=x)

        # feed-forward
        inter = _mm(x, i_w_ref[l]) + i_b_ref[l]                  # (BS, I)
        # TODO(synk): HF BERT uses exact erf-GELU; tanh-approx GELU used here.
        inter = jax.nn.gelu(inter, approximate=True)
        ffn_out = _mm(inter, o_w_ref[l]) + small_ref[base + 3:base + 4, :]
        x = _layernorm(ffn_out,
                       small_ref[base + 4:base + 5, :],
                       small_ref[base + 5:base + 6, :],
                       residual=x)

    # ---- pooler (CLS token per batch via one-hot select matmul) + classifier
    row_id = jax.lax.broadcasted_iota(jnp.int32, (batch, BS), 0) * seq
    col_id = jax.lax.broadcasted_iota(jnp.int32, (batch, BS), 1)
    cls_sel = (row_id == col_id).astype(jnp.float32)             # (B, BS)
    cls_tok = _mm(cls_sel, x)                                    # (B, H)
    pooled = jnp.tanh(_mm(cls_tok, pool_w_ref[...])
                      + small_ref[_ROW_POOL_B:_ROW_POOL_B + 1, :])
    logits = (_mm(pooled, cls_w_ref[...])
              + small_ref[_ROW_CLS_B:_ROW_CLS_B + 1, 0:NUM_CLASSES])
    logits_ref[...] = logits.astype(logits_ref.dtype)


# ----------------------------- parameters -----------------------------------
def init_params(key):
    std = 0.02
    scale = 1.0 / math.sqrt(HEAD_DIM)

    def norm(k, shape):
        return jax.random.normal(k, shape, jnp.float32) * std

    keys = jax.random.split(key, 5 + NUM_LAYERS)
    word_emb = norm(keys[0], (VOCAB_SIZE, HIDDEN))
    pos_emb = norm(keys[1], (MAX_POS, HIDDEN))
    tok_emb = norm(keys[2], (TYPE_VOCAB, HIDDEN))
    pooler_w = norm(keys[3], (HIDDEN, HIDDEN))
    cls_w = norm(keys[4], (HIDDEN, NUM_CLASSES))

    # TODO(synk): token_type_ids hard-coded to 0; type-0 embedding folded into
    # the positional table at init (per the perf review).
    pos_tok_emb = pos_emb + tok_emb[0:1, :]

    qkv_w, qkv_b, ao_w, i_w, i_b, o_w = [], [], [], [], [], []
    small_rows = [jnp.ones((1, HIDDEN), jnp.float32),    # emb_ln_g
                  jnp.zeros((1, HIDDEN), jnp.float32)]   # emb_ln_b
    for l in range(NUM_LAYERS):
        lk = jax.random.split(keys[5 + l], 6)
        # 1/sqrt(dH) attention scale folded into Wq at init.  (The q bias is
        # zeros here; a real checkpoint q bias must also be scaled.)
        qw = norm(lk[0], (HIDDEN, HIDDEN)) * scale
        kw = norm(lk[1], (HIDDEN, HIDDEN))
        vw = norm(lk[2], (HIDDEN, HIDDEN))
        qkv_w.append(jnp.concatenate([qw, kw, vw], axis=1))       # (H, 3H)
        qkv_b.append(jnp.zeros((1, 3 * HIDDEN), jnp.float32))     # (1, 3H)
        ao_w.append(norm(lk[3], (HIDDEN, HIDDEN)))
        i_w.append(norm(lk[4], (HIDDEN, INTERMEDIATE)))
        i_b.append(jnp.zeros((1, INTERMEDIATE), jnp.float32))
        o_w.append(norm(lk[5], (INTERMEDIATE, HIDDEN)))
        small_rows += [jnp.zeros((1, HIDDEN), jnp.float32),  # ao_b
                       jnp.ones((1, HIDDEN), jnp.float32),   # ao_ln_g
                       jnp.zeros((1, HIDDEN), jnp.float32),  # ao_ln_b
                       jnp.zeros((1, HIDDEN), jnp.float32),  # o_b
                       jnp.ones((1, HIDDEN), jnp.float32),   # o_ln_g
                       jnp.zeros((1, HIDDEN), jnp.float32)]  # o_ln_b
    small_rows.append(jnp.zeros((1, HIDDEN), jnp.float32))   # pooler_b
    small_rows.append(jnp.zeros((1, HIDDEN), jnp.float32))   # cls_b (padded)
    small = jnp.concatenate(small_rows, axis=0)
    assert small.shape == (_N_SMALL_ROWS, HIDDEN)

    return {
        "word_emb": word_emb,
        "pos_tok_emb": pos_tok_emb,
        "pooler_w": pooler_w,
        "cls_w": cls_w,
        "qkv_w": jnp.stack(qkv_w), "qkv_b": jnp.stack(qkv_b),
        "ao_w": jnp.stack(ao_w),
        "i_w": jnp.stack(i_w), "i_b": jnp.stack(i_b),
        "o_w": jnp.stack(o_w),
        "small": small,
    }


# ----------------------------- forward pass ----------------------------------
def custom_bert_forward(params, input_ids, attention_mask):
    B, S = input_ids.shape
    BS = B * S
    ids2d = input_ids.reshape(BS, 1).astype(jnp.int32)
    mask_row = attention_mask.astype(jnp.float32).reshape(1, BS)   # lane-major
    # pre-tiled positional (+ token-type-0) table, one operand of shape (BS,H)
    pos_tok = jnp.tile(params["pos_tok_emb"][:S, :], (B, 1))

    kernel = functools.partial(_bert_fused_kernel, batch=B, seq=S)
    return pl.pallas_call(
        kernel,
        out_shape=jax.ShapeDtypeStruct((B, NUM_CLASSES), jnp.float32),
        in_specs=[_VMEM] * 13,
        out_specs=_VMEM,
    )(
        ids2d, mask_row,
        params["word_emb"], pos_tok,
        params["qkv_w"], params["qkv_b"], params["ao_w"],
        params["i_w"], params["i_b"], params["o_w"],
        params["pooler_w"], params["cls_w"], params["small"],
    )


# ----------------------------- main ------------------------------------------
if __name__ == "__main__":
    key = jax.random.PRNGKey(0)
    k_param, k_ids = jax.random.split(key)

    B, S = 2, 8
    params = init_params(k_param)
    input_ids = jax.random.randint(k_ids, (B, S), 0, VOCAB_SIZE, dtype=jnp.int32)
    attention_mask = jnp.array(
        [[1, 1, 1, 1, 1, 1, 1, 1],
         [1, 1, 1, 1, 1, 0, 0, 0]], dtype=jnp.int32)

    logits = custom_bert_forward(params, input_ids, attention_mask)
    logits = jax.block_until_ready(logits)
    assert logits.shape == (B, NUM_CLASSES)
    assert bool(jnp.all(jnp.isfinite(logits)))
    print("KERNEL_OK")
</pallas_src>

<mosaic_0001>
module attributes {stable_mosaic.version = 11 : i64} {
  func.func @_bert_fused_kernel(%arg0: memref<16x1xi32, #tpu.memory_space<vmem>>, %arg1: memref<1x16xf32, #tpu.memory_space<vmem>>, %arg2: memref<128x32xf32, #tpu.memory_space<vmem>>, %arg3: memref<16x32xf32, #tpu.memory_space<vmem>>, %arg4: memref<2x32x96xf32, #tpu.memory_space<vmem>>, %arg5: memref<2x1x96xf32, #tpu.memory_space<vmem>>, %arg6: memref<2x32x32xf32, #tpu.memory_space<vmem>>, %arg7: memref<2x32x64xf32, #tpu.memory_space<vmem>>, %arg8: memref<2x1x64xf32, #tpu.memory_space<vmem>>, %arg9: memref<2x64x32xf32, #tpu.memory_space<vmem>>, %arg10: memref<32x32xf32, #tpu.memory_space<vmem>>, %arg11: memref<32x2xf32, #tpu.memory_space<vmem>>, %arg12: memref<16x32xf32, #tpu.memory_space<vmem>>, %arg13: memref<2x2xf32, #tpu.memory_space<vmem>>) attributes {dimension_semantics = [], scalar_prefetch = 0 : i64, scratch_operands = 0 : i64, tpu.core_type = #tpu.core_type<tc>} {
    %c0 = arith.constant 0 : index
    %c0_0 = arith.constant 0 : index
    %0 = vector.load %arg0[%c0, %c0_0] : memref<16x1xi32, #tpu.memory_space<vmem>>, vector<16x1xi32>
    %1 = tpu.iota {dimensions = array<i32: 1>} : vector<16x128xi32>
    %2 = vector.broadcast %0 : vector<16x1xi32> to vector<16x128xi32>
    %3 = arith.cmpi eq, %2, %1 : vector<16x128xi32>
    %4 = arith.extui %3 : vector<16x128xi1> to vector<16x128xi32>
    %5 = arith.sitofp %4 : vector<16x128xi32> to vector<16x128xf32>
    %c0_1 = arith.constant 0 : index
    %c0_2 = arith.constant 0 : index
    %6 = vector.load %arg2[%c0_1, %c0_2] : memref<128x32xf32, #tpu.memory_space<vmem>>, vector<128x32xf32>
    %7 = arith.truncf %5 : vector<16x128xf32> to vector<16x128xbf16>
    %8 = arith.truncf %6 : vector<128x32xf32> to vector<128x32xbf16>
    %cst = arith.constant dense<0.000000e+00> : vector<16x32xf32>
    %9 = tpu.matmul %7, %8, %cst {dimension_numbers = #tpu.dot_dimension_numbers<[1], [0], [0], [1], [0, 0, 1, 1], [], []>} : vector<16x128xbf16>, vector<128x32xbf16>, vector<16x32xf32> -> vector<16x32xf32>
    %c0_3 = arith.constant 0 : index
    %c0_4 = arith.constant 0 : index
    %10 = vector.load %arg3[%c0_3, %c0_4] : memref<16x32xf32, #tpu.memory_space<vmem>>, vector<16x32xf32>
    %11 = arith.addf %9, %10 : vector<16x32xf32>
    %c0_5 = arith.constant 0 : index
    %c0_6 = arith.constant 0 : index
    %12 = vector.load %arg12[%c0_5, %c0_6] : memref<16x32xf32, #tpu.memory_space<vmem>>, vector<1x32xf32>
    %c1 = arith.constant 1 : index
    %c0_7 = arith.constant 0 : index
    %13 = vector.load %arg12[%c1, %c0_7] : memref<16x32xf32, #tpu.memory_space<vmem>>, vector<1x32xf32>
    %cst_8 = arith.constant dense<0.000000e+00> : vector<16xf32>
    %14 = vector.multi_reduction <add>, %11, %cst_8 [1] : vector<16x32xf32> to vector<16xf32>
    %15 = vector.shape_cast %14 : vector<16xf32> to vector<16x1xf32>
    %cst_9 = arith.constant 3.200000e+01 : f32
    %16 = vector.broadcast %cst_9 : f32 to vector<16x1xf32>
    %17 = arith.divf %15, %16 : vector<16x1xf32>
    %18 = vector.broadcast %17 : vector<16x1xf32> to vector<16x32xf32>
    %19 = arith.subf %11, %18 : vector<16x32xf32>
    %20 = arith.mulf %19, %19 : vector<16x32xf32>
    %cst_10 = arith.constant dense<0.000000e+00> : vector<16xf32>
    %21 = vector.multi_reduction <add>, %20, %cst_10 [1] : vector<16x32xf32> to vector<16xf32>
    %22 = vector.shape_cast %21 : vector<16xf32> to vector<16x1xf32>
    %cst_11 = arith.constant 3.200000e+01 : f32
    %23 = vector.broadcast %cst_11 : f32 to vector<16x1xf32>
    %24 = arith.divf %22, %23 : vector<16x1xf32>
    %cst_12 = arith.constant 9.99999996E-13 : f32
    %25 = vector.broadcast %cst_12 : f32 to vector<16x1xf32>
    %26 = arith.addf %24, %25 : vector<16x1xf32>
    %27 = math.rsqrt %26 : vector<16x1xf32>
    %28 = vector.broadcast %27 : vector<16x1xf32> to vector<16x32xf32>
    %29 = arith.mulf %19, %28 : vector<16x32xf32>
    %30 = vector.broadcast %12 : vector<1x32xf32> to vector<16x32xf32>
    %31 = arith.mulf %29, %30 : vector<16x32xf32>
    %32 = vector.broadcast %13 : vector<1x32xf32> to vector<16x32xf32>
    %33 = arith.addf %31, %32 : vector<16x32xf32>
    %34 = tpu.iota {dimensions = array<i32: 0>} : vector<16x16xi32>
    %35 = arith.sitofp %34 : vector<16x16xi32> to vector<16x16xf32>
    %cst_13 = arith.constant 5.000000e-01 : f32
    %36 = vector.broadcast %cst_13 : f32 to vector<16x16xf32>
    %37 = arith.addf %35, %36 : vector<16x16xf32>
    %cst_14 = arith.constant 1.250000e-01 : f32
    %38 = vector.broadcast %cst_14 : f32 to vector<16x16xf32>
    %39 = arith.mulf %37, %38 : vector<16x16xf32>
    %40 = math.floor %39 : vector<16x16xf32>
    %41 = tpu.iota {dimensions = array<i32: 1>} : vector<16x16xi32>
    %42 = arith.sitofp %41 : vector<16x16xi32> to vector<16x16xf32>
    %cst_15 = arith.constant 5.000000e-01 : f32
    %43 = vector.broadcast %cst_15 : f32 to vector<16x16xf32>
    %44 = arith.addf %42, %43 : vector<16x16xf32>
    %cst_16 = arith.constant 1.250000e-01 : f32
    %45 = vector.broadcast %cst_16 : f32 to vector<16x16xf32>
    %46 = arith.mulf %44, %45 : vector<16x16xf32>
    %47 = math.floor %46 : vector<16x16xf32>
    %c0_17 = arith.constant 0 : index
    %c0_18 = arith.constant 0 : index
    %48 = vector.load %arg1[%c0_17, %c0_18] : memref<1x16xf32, #tpu.memory_space<vmem>>, vector<1x16xf32>
    %cst_19 = arith.constant 5.000000e-01 : f32
    %49 = vector.broadcast %cst_19 : f32 to vector<1x16xf32>
    %50 = arith.cmpf ogt, %48, %49 : vector<1x16xf32>
    %51 = arith.cmpf oeq, %40, %47 : vector<16x16xf32>
    %52 = vector.broadcast %50 : vector<1x16xi1> to vector<16x16xi1>
    %53 = arith.andi %51, %52 : vector<16x16xi1>
    %cst_20 = arith.constant 0.000000e+00 : f32
    %cst_21 = arith.constant -1.000000e+09 : f32
    %54 = vector.broadcast %cst_20 : f32 to vector<16x16xf32>
    %55 = vector.broadcast %cst_21 : f32 to vector<16x16xf32>
    %56 = arith.select %53, %54, %55 : vector<16x16xi1>, vector<16x16xf32>
    %c0_22 = arith.constant 0 : index
    %c0_23 = arith.constant 0 : index
    %c0_24 = arith.constant 0 : index
    %57 = vector.load %arg4[%c0_22, %c0_23, %c0_24] : memref<2x32x96xf32, #tpu.memory_space<vmem>>, vector<1x32x96xf32>
    %58 = vector.shape_cast %57 : vector<1x32x96xf32> to vector<32x96xf32>
    %59 = arith.truncf %33 : vector<16x32xf32> to vector<16x32xbf16>
    %60 = arith.truncf %58 : vector<32x96xf32> to vector<32x96xbf16>
    %cst_25 = arith.constant dense<0.000000e+00> : vector<16x96xf32>
    %61 = tpu.matmul %59, %60, %cst_25 {dimension_numbers = #tpu.dot_dimension_numbers<[1], [0], [0], [1], [0, 0, 1, 1], [], []>} : vector<16x32xbf16>, vector<32x96xbf16>, vector<16x96xf32> -> vector<16x96xf32>
    %c0_26 = arith.constant 0 : index
    %c0_27 = arith.constant 0 : index
    %c0_28 = arith.constant 0 : index
    %62 = vector.load %arg5[%c0_26, %c0_27, %c0_28] : memref<2x1x96xf32, #tpu.memory_space<vmem>>, vector<1x1x96xf32>
    %63 = vector.shape_cast %62 : vector<1x1x96xf32> to vector<1x96xf32>
    %64 = vector.broadcast %63 : vector<1x96xf32> to vector<16x96xf32>
    %65 = arith.addf %61, %64 : vector<16x96xf32>
    %66 = vector.extract_strided_slice %65 {offsets = [0, 0], sizes = [16, 16], strides = [1, 1]} : vector<16x96xf32> to vector<16x16xf32>
    %67 = vector.extract_strided_slice %65 {offsets = [0, 32], sizes = [16, 16], strides = [1, 1]} : vector<16x96xf32> to vector<16x16xf32>
    %68 = vector.extract_strided_slice %65 {offsets = [0, 64], sizes = [16, 16], strides = [1, 1]} : vector<16x96xf32> to vector<16x16xf32>
    %69 = arith.truncf %66 : vector<16x16xf32> to vector<16x16xbf16>
    %70 = arith.truncf %67 : vector<16x16xf32> to vector<16x16xbf16>
    %cst_29 = arith.constant dense<0.000000e+00> : vector<16x16xf32>
    %71 = tpu.matmul %69, %70, %cst_29 {dimension_numbers = #tpu.dot_dimension_numbers<[1], [1], [0], [0], [0, 0, 1, 0], [], []>} : vector<16x16xbf16>, vector<16x16xbf16>, vector<16x16xf32> -> vector<16x16xf32>
    %72 = arith.addf %71, %56 : vector<16x16xf32>
    %cst_30 = arith.constant dense<0xFF800000> : vector<16xf32>
    %73 = vector.multi_reduction <maximumf>, %72, %cst_30 [1] : vector<16x16xf32> to vector<16xf32>
    %74 = vector.shape_cast %73 : vector<16xf32> to vector<16x1xf32>
    %75 = vector.broadcast %74 : vector<16x1xf32> to vector<16x16xf32>
    %76 = arith.subf %72, %75 : vector<16x16xf32>
    %77 = math.exp %76 : vector<16x16xf32>
    %cst_31 = arith.constant dense<0.000000e+00> : vector<16xf32>
    %78 = vector.multi_reduction <add>, %77, %cst_31 [1] : vector<16x16xf32> to vector<16xf32>
    %79 = vector.shape_cast %78 : vector<16xf32> to vector<16x1xf32>
    %80 = tpu.reciprocal %79 {approx = true} : vector<16x1xf32> -> vector<16x1xf32>
    %81 = vector.broadcast %80 : vector<16x1xf32> to vector<16x16xf32>
    %82 = arith.mulf %77, %81 : vector<16x16xf32>
    %83 = arith.truncf %82 : vector<16x16xf32> to vector<16x16xbf16>
    %84 = arith.truncf %68 : vector<16x16xf32> to vector<16x16xbf16>
    %cst_32 = arith.constant dense<0.000000e+00> : vector<16x16xf32>
    %85 = tpu.matmul %83, %84, %cst_32 {dimension_numbers = #tpu.dot_dimension_numbers<[1], [0], [0], [1], [0, 0, 1, 1], [], []>} : vector<16x16xbf16>, vector<16x16xbf16>, vector<16x16xf32> -> vector<16x16xf32>
    %86 = vector.extract_strided_slice %65 {offsets = [0, 16], sizes = [16, 16], strides = [1, 1]} : vector<16x96xf32> to vector<16x16xf32>
    %87 = vector.extract_strided_slice %65 {offsets = [0, 48], sizes = [16, 16], strides = [1, 1]} : vector<16x96xf32> to vector<16x16xf32>
    %88 = vector.extract_strided_slice %65 {offsets = [0, 80], sizes = [16, 16], strides = [1, 1]} : vector<16x96xf32> to vector<16x16xf32>
    %89 = arith.truncf %86 : vector<16x16xf32> to vector<16x16xbf16>
    %90 = arith.truncf %87 : vector<16x16xf32> to vector<16x16xbf16>
    %cst_33 = arith.constant dense<0.000000e+00> : vector<16x16xf32>
    %91 = tpu.matmul %89, %90, %cst_33 {dimension_numbers = #tpu.dot_dimension_numbers<[1], [1], [0], [0], [0, 0, 1, 0], [], []>} : vector<16x16xbf16>, vector<16x16xbf16>, vector<16x16xf32> -> vector<16x16xf32>
    %92 = arith.addf %91, %56 : vector<16x16xf32>
    %cst_34 = arith.constant dense<0xFF800000> : vector<16xf32>
    %93 = vector.multi_reduction <maximumf>, %92, %cst_34 [1] : vector<16x16xf32> to vector<16xf32>
    %94 = vector.shape_cast %93 : vector<16xf32> to vector<16x1xf32>
    %95 = vector.broadcast %94 : vector<16x1xf32> to vector<16x16xf32>
    %96 = arith.subf %92, %95 : vector<16x16xf32>
    %97 = math.exp %96 : vector<16x16xf32>
    %cst_35 = arith.constant dense<0.000000e+00> : vector<16xf32>
    %98 = vector.multi_reduction <add>, %97, %cst_35 [1] : vector<16x16xf32> to vector<16xf32>
    %99 = vector.shape_cast %98 : vector<16xf32> to vector<16x1xf32>
    %100 = tpu.reciprocal %99 {approx = true} : vector<16x1xf32> -> vector<16x1xf32>
    %101 = vector.broadcast %100 : vector<16x1xf32> to vector<16x16xf32>
    %102 = arith.mulf %97, %101 : vector<16x16xf32>
    %103 = arith.truncf %102 : vector<16x16xf32> to vector<16x16xbf16>
    %104 = arith.truncf %88 : vector<16x16xf32> to vector<16x16xbf16>
    %cst_36 = arith.constant dense<0.000000e+00> : vector<16x16xf32>
    %105 = tpu.matmul %103, %104, %cst_36 {dimension_numbers = #tpu.dot_dimension_numbers<[1], [0], [0], [1], [0, 0, 1, 1], [], []>} : vector<16x16xbf16>, vector<16x16xbf16>, vector<16x16xf32> -> vector<16x16xf32>
    %106 = tpu.concatenate %85, %105 in 1 : vector<16x16xf32>, vector<16x16xf32> -> vector<16x32xf32>
    %c0_37 = arith.constant 0 : index
    %c0_38 = arith.constant 0 : index
    %c0_39 = arith.constant 0 : index
    %107 = vector.load %arg6[%c0_37, %c0_38, %c0_39] : memref<2x32x32xf32, #tpu.memory_space<vmem>>, vector<1x32x32xf32>
    %108 = vector.shape_cast %107 : vector<1x32x32xf32> to vector<32x32xf32>
    %109 = arith.truncf %106 : vector<16x32xf32> to vector<16x32xbf16>
    %110 = arith.truncf %108 : vector<32x32xf32> to vector<32x32xbf16>
    %cst_40 = arith.constant dense<0.000000e+00> : vector<16x32xf32>
    %111 = tpu.matmul %109, %110, %cst_40 {dimension_numbers = #tpu.dot_dimension_numbers<[1], [0], [0], [1], [0, 0, 1, 1], [], []>} : vector<16x32xbf16>, vector<32x32xbf16>, vector<16x32xf32> -> vector<16x32xf32>
    %c2 = arith.constant 2 : index
    %c0_41 = arith.constant 0 : index
    %112 = vector.load %arg12[%c2, %c0_41] : memref<16x32xf32, #tpu.memory_space<vmem>>, vector<1x32xf32>
    %113 = vector.broadcast %112 : vector<1x32xf32> to vector<16x32xf32>
    %114 = arith.addf %111, %113 : vector<16x32xf32>
    %c3 = arith.constant 3 : index
    %c0_42 = arith.constant 0 : index
    %115 = vector.load %arg12[%c3, %c0_42] : memref<16x32xf32, #tpu.memory_space<vmem>>, vector<1x32xf32>
    %c4 = arith.constant 4 : index
    %c0_43 = arith.constant 0 : index
    %116 = vector.load %arg12[%c4, %c0_43] : memref<16x32xf32, #tpu.memory_space<vmem>>, vector<1x32xf32>
    %117 = arith.addf %114, %33 : vector<16x32xf32>
    %cst_44 = arith.constant dense<0.000000e+00> : vector<16xf32>
    %118 = vector.multi_reduction <add>, %117, %cst_44 [1] : vector<16x32xf32> to vector<16xf32>
    %119 = vector.shape_cast %118 : vector<16xf32> to vector<16x1xf32>
    %cst_45 = arith.constant 3.200000e+01 : f32
    %120 = vector.broadcast %cst_45 : f32 to vector<16x1xf32>
    %121 = arith.divf %119, %120 : vector<16x1xf32>
    %122 = vector.broadcast %121 : vector<16x1xf32> to vector<16x32xf32>
    %123 = arith.subf %117, %122 : vector<16x32xf32>
    %124 = arith.mulf %123, %123 : vector<16x32xf32>
    %cst_46 = arith.constant dense<0.000000e+00> : vector<16xf32>
    %125 = vector.multi_reduction <add>, %124, %cst_46 [1] : vector<16x32xf32> to vector<16xf32>
    %126 = vector.shape_cast %125 : vector<16xf32> to vector<16x1xf32>
    %cst_47 = arith.constant 3.200000e+01 : f32
    %127 = vector.broadcast %cst_47 : f32 to vector<16x1xf32>
    %128 = arith.divf %126, %127 : vector<16x1xf32>
    %cst_48 = arith.constant 9.99999996E-13 : f32
    %129 = vector.broadcast %cst_48 : f32 to vector<16x1xf32>
    %130 = arith.addf %128, %129 : vector<16x1xf32>
    %131 = math.rsqrt %130 : vector<16x1xf32>
    %132 = vector.broadcast %131 : vector<16x1xf32> to vector<16x32xf32>
    %133 = arith.mulf %123, %132 : vector<16x32xf32>
    %134 = vector.broadcast %115 : vector<1x32xf32> to vector<16x32xf32>
    %135 = arith.mulf %133, %134 : vector<16x32xf32>
    %136 = vector.broadcast %116 : vector<1x32xf32> to vector<16x32xf32>
    %137 = arith.addf %135, %136 : vector<16x32xf32>
    %c0_49 = arith.constant 0 : index
    %c0_50 = arith.constant 0 : index
    %c0_51 = arith.constant 0 : index
    %138 = vector.load %arg7[%c0_49, %c0_50, %c0_51] : memref<2x32x64xf32, #tpu.memory_space<vmem>>, vector<1x32x64xf32>
    %139 = vector.shape_cast %138 : vector<1x32x64xf32> to vector<32x64xf32>
    %140 = arith.truncf %137 : vector<16x32xf32> to vector<16x32xbf16>
    %141 = arith.truncf %139 : vector<32x64xf32> to vector<32x64xbf16>
    %cst_52 = arith.constant dense<0.000000e+00> : vector<16x64xf32>
    %142 = tpu.matmul %140, %141, %cst_52 {dimension_numbers = #tpu.dot_dimension_numbers<[1], [0], [0], [1], [0, 0, 1, 1], [], []>} : vector<16x32xbf16>, vector<32x64xbf16>, vector<16x64xf32> -> vector<16x64xf32>
    %c0_53 = arith.constant 0 : index
    %c0_54 = arith.constant 0 : index
    %c0_55 = arith.constant 0 : index
    %143 = vector.load %arg8[%c0_53, %c0_54, %c0_55] : memref<2x1x64xf32, #tpu.memory_space<vmem>>, vector<1x1x64xf32>
    %144 = vector.shape_cast %143 : vector<1x1x64xf32> to vector<1x64xf32>
    %145 = vector.broadcast %144 : vector<1x64xf32> to vector<16x64xf32>
    %146 = arith.addf %142, %145 : vector<16x64xf32>
    %147 = arith.mulf %146, %146 : vector<16x64xf32>
    %148 = arith.mulf %146, %147 : vector<16x64xf32>
    %cst_56 = arith.constant 4.471500e-02 : f32
    %149 = vector.broadcast %cst_56 : f32 to vector<16x64xf32>
    %150 = arith.mulf %149, %148 : vector<16x64xf32>
    %151 = arith.addf %146, %150 : vector<16x64xf32>
    %cst_57 = arith.constant 0.797884583 : f32
    %152 = vector.broadcast %cst_57 : f32 to vector<16x64xf32>
    %153 = arith.mulf %152, %151 : vector<16x64xf32>
    %154 = math.tanh %153 : vector<16x64xf32>
    %cst_58 = arith.constant 1.000000e+00 : f32
    %155 = vector.broadcast %cst_58 : f32 to vector<16x64xf32>
    %156 = arith.addf %155, %154 : vector<16x64xf32>
    %cst_59 = arith.constant 5.000000e-01 : f32
    %157 = vector.broadcast %cst_59 : f32 to vector<16x64xf32>
    %158 = arith.mulf %157, %156 : vector<16x64xf32>
    %159 = arith.mulf %146, %158 : vector<16x64xf32>
    %c0_60 = arith.constant 0 : index
    %c0_61 = arith.constant 0 : index
    %c0_62 = arith.constant 0 : index
    %160 = vector.load %arg9[%c0_60, %c0_61, %c0_62] : memref<2x64x32xf32, #tpu.memory_space<vmem>>, vector<1x64x32xf32>
    %161 = vector.shape_cast %160 : vector<1x64x32xf32> to vector<64x32xf32>
    %162 = arith.truncf %159 : vector<16x64xf32> to vector<16x64xbf16>
    %163 = arith.truncf %161 : vector<64x32xf32> to vector<64x32xbf16>
    %cst_63 = arith.constant dense<0.000000e+00> : vector<16x32xf32>
    %164 = tpu.matmul %162, %163, %cst_63 {dimension_numbers = #tpu.dot_dimension_numbers<[1], [0], [0], [1], [0, 0, 1, 1], [], []>} : vector<16x64xbf16>, vector<64x32xbf16>, vector<16x32xf32> -> vector<16x32xf32>
    %c5 = arith.constant 5 : index
    %c0_64 = arith.constant 0 : index
    %165 = vector.load %arg12[%c5, %c0_64] : memref<16x32xf32, #tpu.memory_space<vmem>>, vector<1x32xf32>
    %166 = vector.broadcast %165 : vector<1x32xf32> to vector<16x32xf32>
    %167 = arith.addf %164, %166 : vector<16x32xf32>
    %c6 = arith.constant 6 : index
    %c0_65 = arith.constant 0 : index
    %168 = vector.load %arg12[%c6, %c0_65] : memref<16x32xf32, #tpu.memory_space<vmem>>, vector<1x32xf32>
    %c7 = arith.constant 7 : index
    %c0_66 = arith.constant 0 : index
    %169 = vector.load %arg12[%c7, %c0_66] : memref<16x32xf32, #tpu.memory_space<vmem>>, vector<1x32xf32>
    %170 = arith.addf %167, %137 : vector<16x32xf32>
    %cst_67 = arith.constant dense<0.000000e+00> : vector<16xf32>
    %171 = vector.multi_reduction <add>, %170, %cst_67 [1] : vector<16x32xf32> to vector<16xf32>
    %172 = vector.shape_cast %171 : vector<16xf32> to vector<16x1xf32>
    %cst_68 = arith.constant 3.200000e+01 : f32
    %173 = vector.broadcast %cst_68 : f32 to vector<16x1xf32>
    %174 = arith.divf %172, %173 : vector<16x1xf32>
    %175 = vector.broadcast %174 : vector<16x1xf32> to vector<16x32xf32>
    %176 = arith.subf %170, %175 : vector<16x32xf32>
    %177 = arith.mulf %176, %176 : vector<16x32xf32>
    %cst_69 = arith.constant dense<0.000000e+00> : vector<16xf32>
    %178 = vector.multi_reduction <add>, %177, %cst_69 [1] : vector<16x32xf32> to vector<16xf32>
    %179 = vector.shape_cast %178 : vector<16xf32> to vector<16x1xf32>
    %cst_70 = arith.constant 3.200000e+01 : f32
    %180 = vector.broadcast %cst_70 : f32 to vector<16x1xf32>
    %181 = arith.divf %179, %180 : vector<16x1xf32>
    %cst_71 = arith.constant 9.99999996E-13 : f32
    %182 = vector.broadcast %cst_71 : f32 to vector<16x1xf32>
    %183 = arith.addf %181, %182 : vector<16x1xf32>
    %184 = math.rsqrt %183 : vector<16x1xf32>
    %185 = vector.broadcast %184 : vector<16x1xf32> to vector<16x32xf32>
    %186 = arith.mulf %176, %185 : vector<16x32xf32>
    %187 = vector.broadcast %168 : vector<1x32xf32> to vector<16x32xf32>
    %188 = arith.mulf %186, %187 : vector<16x32xf32>
    %189 = vector.broadcast %169 : vector<1x32xf32> to vector<16x32xf32>
    %190 = arith.addf %188, %189 : vector<16x32xf32>
    %c1_72 = arith.constant 1 : index
    %c0_73 = arith.constant 0 : index
    %c0_74 = arith.constant 0 : index
    %191 = vector.load %arg4[%c1_72, %c0_73, %c0_74] : memref<2x32x96xf32, #tpu.memory_space<vmem>>, vector<1x32x96xf32>
    %192 = vector.shape_cast %191 : vector<1x32x96xf32> to vector<32x96xf32>
    %193 = arith.truncf %190 : vector<16x32xf32> to vector<16x32xbf16>
    %194 = arith.truncf %192 : vector<32x96xf32> to vector<32x96xbf16>
    %cst_75 = arith.constant dense<0.000000e+00> : vector<16x96xf32>
    %195 = tpu.matmul %193, %194, %cst_75 {dimension_numbers = #tpu.dot_dimension_numbers<[1], [0], [0], [1], [0, 0, 1, 1], [], []>} : vector<16x32xbf16>, vector<32x96xbf16>, vector<16x96xf32> -> vector<16x96xf32>
    %c1_76 = arith.constant 1 : index
    %c0_77 = arith.constant 0 : index
    %c0_78 = arith.constant 0 : index
    %196 = vector.load %arg5[%c1_76, %c0_77, %c0_78] : memref<2x1x96xf32, #tpu.memory_space<vmem>>, vector<1x1x96xf32>
    %197 = vector.shape_cast %196 : vector<1x1x96xf32> to vector<1x96xf32>
    %198 = vector.broadcast %197 : vector<1x96xf32> to vector<16x96xf32>
    %199 = arith.addf %195, %198 : vector<16x96xf32>
    %200 = vector.extract_strided_slice %199 {offsets = [0, 0], sizes = [16, 16], strides = [1, 1]} : vector<16x96xf32> to vector<16x16xf32>
    %201 = vector.extract_strided_slice %199 {offsets = [0, 32], sizes = [16, 16], strides = [1, 1]} : vector<16x96xf32> to vector<16x16xf32>
    %202 = vector.extract_strided_slice %199 {offsets = [0, 64], sizes = [16, 16], strides = [1, 1]} : vector<16x96xf32> to vector<16x16xf32>
    %203 = arith.truncf %200 : vector<16x16xf32> to vector<16x16xbf16>
    %204 = arith.truncf %201 : vector<16x16xf32> to vector<16x16xbf16>
    %cst_79 = arith.constant dense<0.000000e+00> : vector<16x16xf32>
    %205 = tpu.matmul %203, %204, %cst_79 {dimension_numbers = #tpu.dot_dimension_numbers<[1], [1], [0], [0], [0, 0, 1, 0], [], []>} : vector<16x16xbf16>, vector<16x16xbf16>, vector<16x16xf32> -> vector<16x16xf32>
    %206 = arith.addf %205, %56 : vector<16x16xf32>
    %cst_80 = arith.constant dense<0xFF800000> : vector<16xf32>
    %207 = vector.multi_reduction <maximumf>, %206, %cst_80 [1] : vector<16x16xf32> to vector<16xf32>
    %208 = vector.shape_cast %207 : vector<16xf32> to vector<16x1xf32>
    %209 = vector.broadcast %208 : vector<16x1xf32> to vector<16x16xf32>
    %210 = arith.subf %206, %209 : vector<16x16xf32>
    %211 = math.exp %210 : vector<16x16xf32>
    %cst_81 = arith.constant dense<0.000000e+00> : vector<16xf32>
    %212 = vector.multi_reduction <add>, %211, %cst_81 [1] : vector<16x16xf32> to vector<16xf32>
    %213 = vector.shape_cast %212 : vector<16xf32> to vector<16x1xf32>
    %214 = tpu.reciprocal %213 {approx = true} : vector<16x1xf32> -> vector<16x1xf32>
    %215 = vector.broadcast %214 : vector<16x1xf32> to vector<16x16xf32>
    %216 = arith.mulf %211, %215 : vector<16x16xf32>
    %217 = arith.truncf %216 : vector<16x16xf32> to vector<16x16xbf16>
    %218 = arith.truncf %202 : vector<16x16xf32> to vector<16x16xbf16>
    %cst_82 = arith.constant dense<0.000000e+00> : vector<16x16xf32>
    %219 = tpu.matmul %217, %218, %cst_82 {dimension_numbers = #tpu.dot_dimension_numbers<[1], [0], [0], [1], [0, 0, 1, 1], [], []>} : vector<16x16xbf16>, vector<16x16xbf16>, vector<16x16xf32> -> vector<16x16xf32>
    %220 = vector.extract_strided_slice %199 {offsets = [0, 16], sizes = [16, 16], strides = [1, 1]} : vector<16x96xf32> to vector<16x16xf32>
    %221 = vector.extract_strided_slice %199 {offsets = [0, 48], sizes = [16, 16], strides = [1, 1]} : vector<16x96xf32> to vector<16x16xf32>
    %222 = vector.extract_strided_slice %199 {offsets = [0, 80], sizes = [16, 16], strides = [1, 1]} : vector<16x96xf32> to vector<16x16xf32>
    %223 = arith.truncf %220 : vector<16x16xf32> to vector<16x16xbf16>
    %224 = arith.truncf %221 : vector<16x16xf32> to vector<16x16xbf16>
    %cst_83 = arith.constant dense<0.000000e+00> : vector<16x16xf32>
    %225 = tpu.matmul %223, %224, %cst_83 {dimension_numbers = #tpu.dot_dimension_numbers<[1], [1], [0], [0], [0, 0, 1, 0], [], []>} : vector<16x16xbf16>, vector<16x16xbf16>, vector<16x16xf32> -> vector<16x16xf32>
    %226 = arith.addf %225, %56 : vector<16x16xf32>
    %cst_84 = arith.constant dense<0xFF800000> : vector<16xf32>
    %227 = vector.multi_reduction <maximumf>, %226, %cst_84 [1] : vector<16x16xf32> to vector<16xf32>
    %228 = vector.shape_cast %227 : vector<16xf32> to vector<16x1xf32>
    %229 = vector.broadcast %228 : vector<16x1xf32> to vector<16x16xf32>
    %230 = arith.subf %226, %229 : vector<16x16xf32>
    %231 = math.exp %230 : vector<16x16xf32>
    %cst_85 = arith.constant dense<0.000000e+00> : vector<16xf32>
    %232 = vector.multi_reduction <add>, %231, %cst_85 [1] : vector<16x16xf32> to vector<16xf32>
    %233 = vector.shape_cast %232 : vector<16xf32> to vector<16x1xf32>
    %234 = tpu.reciprocal %233 {approx = true} : vector<16x1xf32> -> vector<16x1xf32>
    %235 = vector.broadcast %234 : vector<16x1xf32> to vector<16x16xf32>
    %236 = arith.mulf %231, %235 : vector<16x16xf32>
    %237 = arith.truncf %236 : vector<16x16xf32> to vector<16x16xbf16>
    %238 = arith.truncf %222 : vector<16x16xf32> to vector<16x16xbf16>
    %cst_86 = arith.constant dense<0.000000e+00> : vector<16x16xf32>
    %239 = tpu.matmul %237, %238, %cst_86 {dimension_numbers = #tpu.dot_dimension_numbers<[1], [0], [0], [1], [0, 0, 1, 1], [], []>} : vector<16x16xbf16>, vector<16x16xbf16>, vector<16x16xf32> -> vector<16x16xf32>
    %240 = tpu.concatenate %219, %239 in 1 : vector<16x16xf32>, vector<16x16xf32> -> vector<16x32xf32>
    %c1_87 = arith.constant 1 : index
    %c0_88 = arith.constant 0 : index
    %c0_89 = arith.constant 0 : index
    %241 = vector.load %arg6[%c1_87, %c0_88, %c0_89] : memref<2x32x32xf32, #tpu.memory_space<vmem>>, vector<1x32x32xf32>
    %242 = vector.shape_cast %241 : vector<1x32x32xf32> to vector<32x32xf32>
    %243 = arith.truncf %240 : vector<16x32xf32> to vector<16x32xbf16>
    %244 = arith.truncf %242 : vector<32x32xf32> to vector<32x32xbf16>
    %cst_90 = arith.constant dense<0.000000e+00> : vector<16x32xf32>
    %245 = tpu.matmul %243, %244, %cst_90 {dimension_numbers = #tpu.dot_dimension_numbers<[1], [0], [0], [1], [0, 0, 1, 1], [], []>} : vector<16x32xbf16>, vector<32x32xbf16>, vector<16x32xf32> -> vector<16x32xf32>
    %c8 = arith.constant 8 : index
    %c0_91 = arith.constant 0 : index
    %246 = vector.load %arg12[%c8, %c0_91] : memref<16x32xf32, #tpu.memory_space<vmem>>, vector<1x32xf32>
    %247 = vector.broadcast %246 : vector<1x32xf32> to vector<16x32xf32>
    %248 = arith.addf %245, %247 : vector<16x32xf32>
    %c9 = arith.constant 9 : index
    %c0_92 = arith.constant 0 : index
    %249 = vector.load %arg12[%c9, %c0_92] : memref<16x32xf32, #tpu.memory_space<vmem>>, vector<1x32xf32>
    %c10 = arith.constant 10 : index
    %c0_93 = arith.constant 0 : index
    %250 = vector.load %arg12[%c10, %c0_93] : memref<16x32xf32, #tpu.memory_space<vmem>>, vector<1x32xf32>
    %251 = arith.addf %248, %190 : vector<16x32xf32>
    %cst_94 = arith.constant dense<0.000000e+00> : vector<16xf32>
    %252 = vector.multi_reduction <add>, %251, %cst_94 [1] : vector<16x32xf32> to vector<16xf32>
    %253 = vector.shape_cast %252 : vector<16xf32> to vector<16x1xf32>
    %cst_95 = arith.constant 3.200000e+01 : f32
    %254 = vector.broadcast %cst_95 : f32 to vector<16x1xf32>
    %255 = arith.divf %253, %254 : vector<16x1xf32>
    %256 = vector.broadcast %255 : vector<16x1xf32> to vector<16x32xf32>
    %257 = arith.subf %251, %256 : vector<16x32xf32>
    %258 = arith.mulf %257, %257 : vector<16x32xf32>
    %cst_96 = arith.constant dense<0.000000e+00> : vector<16xf32>
    %259 = vector.multi_reduction <add>, %258, %cst_96 [1] : vector<16x32xf32> to vector<16xf32>
    %260 = vector.shape_cast %259 : vector<16xf32> to vector<16x1xf32>
    %cst_97 = arith.constant 3.200000e+01 : f32
    %261 = vector.broadcast %cst_97 : f32 to vector<16x1xf32>
    %262 = arith.divf %260, %261 : vector<16x1xf32>
    %cst_98 = arith.constant 9.99999996E-13 : f32
    %263 = vector.broadcast %cst_98 : f32 to vector<16x1xf32>
    %264 = arith.addf %262, %263 : vector<16x1xf32>
    %265 = math.rsqrt %264 : vector<16x1xf32>
    %266 = vector.broadcast %265 : vector<16x1xf32> to vector<16x32xf32>
    %267 = arith.mulf %257, %266 : vector<16x32xf32>
    %268 = vector.broadcast %249 : vector<1x32xf32> to vector<16x32xf32>
    %269 = arith.mulf %267, %268 : vector<16x32xf32>
    %270 = vector.broadcast %250 : vector<1x32xf32> to vector<16x32xf32>
    %271 = arith.addf %269, %270 : vector<16x32xf32>
    %c1_99 = arith.constant 1 : index
    %c0_100 = arith.constant 0 : index
    %c0_101 = arith.constant 0 : index
    %272 = vector.load %arg7[%c1_99, %c0_100, %c0_101] : memref<2x32x64xf32, #tpu.memory_space<vmem>>, vector<1x32x64xf32>
    %273 = vector.shape_cast %272 : vector<1x32x64xf32> to vector<32x64xf32>
    %274 = arith.truncf %271 : vector<16x32xf32> to vector<16x32xbf16>
    %275 = arith.truncf %273 : vector<32x64xf32> to vector<32x64xbf16>
    %cst_102 = arith.constant dense<0.000000e+00> : vector<16x64xf32>
    %276 = tpu.matmul %274, %275, %cst_102 {dimension_numbers = #tpu.dot_dimension_numbers<[1], [0], [0], [1], [0, 0, 1, 1], [], []>} : vector<16x32xbf16>, vector<32x64xbf16>, vector<16x64xf32> -> vector<16x64xf32>
    %c1_103 = arith.constant 1 : index
    %c0_104 = arith.constant 0 : index
    %c0_105 = arith.constant 0 : index
    %277 = vector.load %arg8[%c1_103, %c0_104, %c0_105] : memref<2x1x64xf32, #tpu.memory_space<vmem>>, vector<1x1x64xf32>
    %278 = vector.shape_cast %277 : vector<1x1x64xf32> to vector<1x64xf32>
    %279 = vector.broadcast %278 : vector<1x64xf32> to vector<16x64xf32>
    %280 = arith.addf %276, %279 : vector<16x64xf32>
    %281 = arith.mulf %280, %280 : vector<16x64xf32>
    %282 = arith.mulf %280, %281 : vector<16x64xf32>
    %cst_106 = arith.constant 4.471500e-02 : f32
    %283 = vector.broadcast %cst_106 : f32 to vector<16x64xf32>
    %284 = arith.mulf %283, %282 : vector<16x64xf32>
    %285 = arith.addf %280, %284 : vector<16x64xf32>
    %cst_107 = arith.constant 0.797884583 : f32
    %286 = vector.broadcast %cst_107 : f32 to vector<16x64xf32>
    %287 = arith.mulf %286, %285 : vector<16x64xf32>
    %288 = math.tanh %287 : vector<16x64xf32>
    %cst_108 = arith.constant 1.000000e+00 : f32
    %289 = vector.broadcast %cst_108 : f32 to vector<16x64xf32>
    %290 = arith.addf %289, %288 : vector<16x64xf32>
    %cst_109 = arith.constant 5.000000e-01 : f32
    %291 = vector.broadcast %cst_109 : f32 to vector<16x64xf32>
    %292 = arith.mulf %291, %290 : vector<16x64xf32>
    %293 = arith.mulf %280, %292 : vector<16x64xf32>
    %c1_110 = arith.constant 1 : index
    %c0_111 = arith.constant 0 : index
    %c0_112 = arith.constant 0 : index
    %294 = vector.load %arg9[%c1_110, %c0_111, %c0_112] : memref<2x64x32xf32, #tpu.memory_space<vmem>>, vector<1x64x32xf32>
    %295 = vector.shape_cast %294 : vector<1x64x32xf32> to vector<64x32xf32>
    %296 = arith.truncf %293 : vector<16x64xf32> to vector<16x64xbf16>
    %297 = arith.truncf %295 : vector<64x32xf32> to vector<64x32xbf16>
    %cst_113 = arith.constant dense<0.000000e+00> : vector<16x32xf32>
    %298 = tpu.matmul %296, %297, %cst_113 {dimension_numbers = #tpu.dot_dimension_numbers<[1], [0], [0], [1], [0, 0, 1, 1], [], []>} : vector<16x64xbf16>, vector<64x32xbf16>, vector<16x32xf32> -> vector<16x32xf32>
    %c11 = arith.constant 11 : index
    %c0_114 = arith.constant 0 : index
    %299 = vector.load %arg12[%c11, %c0_114] : memref<16x32xf32, #tpu.memory_space<vmem>>, vector<1x32xf32>
    %300 = vector.broadcast %299 : vector<1x32xf32> to vector<16x32xf32>
    %301 = arith.addf %298, %300 : vector<16x32xf32>
    %c12 = arith.constant 12 : index
    %c0_115 = arith.constant 0 : index
    %302 = vector.load %arg12[%c12, %c0_115] : memref<16x32xf32, #tpu.memory_space<vmem>>, vector<1x32xf32>
    %c13 = arith.constant 13 : index
    %c0_116 = arith.constant 0 : index
    %303 = vector.load %arg12[%c13, %c0_116] : memref<16x32xf32, #tpu.memory_space<vmem>>, vector<1x32xf32>
    %304 = arith.addf %301, %271 : vector<16x32xf32>
    %cst_117 = arith.constant dense<0.000000e+00> : vector<16xf32>
    %305 = vector.multi_reduction <add>, %304, %cst_117 [1] : vector<16x32xf32> to vector<16xf32>
    %306 = vector.shape_cast %305 : vector<16xf32> to vector<16x1xf32>
    %cst_118 = arith.constant 3.200000e+01 : f32
    %307 = vector.broadcast %cst_118 : f32 to vector<16x1xf32>
    %308 = arith.divf %306, %307 : vector<16x1xf32>
    %309 = vector.broadcast %308 : vector<16x1xf32> to vector<16x32xf32>
    %310 = arith.subf %304, %309 : vector<16x32xf32>
    %311 = arith.mulf %310, %310 : vector<16x32xf32>
    %cst_119 = arith.constant dense<0.000000e+00> : vector<16xf32>
    %312 = vector.multi_reduction <add>, %311, %cst_119 [1] : vector<16x32xf32> to vector<16xf32>
    %313 = vector.shape_cast %312 : vector<16xf32> to vector<16x1xf32>
    %cst_120 = arith.constant 3.200000e+01 : f32
    %314 = vector.broadcast %cst_120 : f32 to vector<16x1xf32>
    %315 = arith.divf %313, %314 : vector<16x1xf32>
    %cst_121 = arith.constant 9.99999996E-13 : f32
    %316 = vector.broadcast %cst_121 : f32 to vector<16x1xf32>
    %317 = arith.addf %315, %316 : vector<16x1xf32>
    %318 = math.rsqrt %317 : vector<16x1xf32>
    %319 = vector.broadcast %318 : vector<16x1xf32> to vector<16x32xf32>
    %320 = arith.mulf %310, %319 : vector<16x32xf32>
    %321 = vector.broadcast %302 : vector<1x32xf32> to vector<16x32xf32>
    %322 = arith.mulf %320, %321 : vector<16x32xf32>
    %323 = vector.broadcast %303 : vector<1x32xf32> to vector<16x32xf32>
    %324 = arith.addf %322, %323 : vector<16x32xf32>
    %325 = tpu.iota {dimensions = array<i32: 0>} : vector<2x16xi32>
    %c8_i32 = arith.constant 8 : i32
    %326 = vector.broadcast %c8_i32 : i32 to vector<2x16xi32>
    %327 = arith.muli %325, %326 : vector<2x16xi32>
    %328 = tpu.iota {dimensions = array<i32: 1>} : vector<2x16xi32>
    %329 = arith.cmpi eq, %327, %328 : vector<2x16xi32>
    %330 = arith.extui %329 : vector<2x16xi1> to vector<2x16xi32>
    %331 = arith.sitofp %330 : vector<2x16xi32> to vector<2x16xf32>
    %332 = arith.truncf %331 : vector<2x16xf32> to vector<2x16xbf16>
    %333 = arith.truncf %324 : vector<16x32xf32> to vector<16x32xbf16>
    %cst_122 = arith.constant dense<0.000000e+00> : vector<2x32xf32>
    %334 = tpu.matmul %332, %333, %cst_122 {dimension_numbers = #tpu.dot_dimension_numbers<[1], [0], [0], [1], [0, 0, 1, 1], [], []>} : vector<2x16xbf16>, vector<16x32xbf16>, vector<2x32xf32> -> vector<2x32xf32>
    %c0_123 = arith.constant 0 : index
    %c0_124 = arith.constant 0 : index
    %335 = vector.load %arg10[%c0_123, %c0_124] : memref<32x32xf32, #tpu.memory_space<vmem>>, vector<32x32xf32>
    %336 = arith.truncf %334 : vector<2x32xf32> to vector<2x32xbf16>
    %337 = arith.truncf %335 : vector<32x32xf32> to vector<32x32xbf16>
    %cst_125 = arith.constant dense<0.000000e+00> : vector<2x32xf32>
    %338 = tpu.matmul %336, %337, %cst_125 {dimension_numbers = #tpu.dot_dimension_numbers<[1], [0], [0], [1], [0, 0, 1, 1], [], []>} : vector<2x32xbf16>, vector<32x32xbf16>, vector<2x32xf32> -> vector<2x32xf32>
    %c14 = arith.constant 14 : index
    %c0_126 = arith.constant 0 : index
    %339 = vector.load %arg12[%c14, %c0_126] : memref<16x32xf32, #tpu.memory_space<vmem>>, vector<1x32xf32>
    %340 = vector.broadcast %339 : vector<1x32xf32> to vector<2x32xf32>
    %341 = arith.addf %338, %340 : vector<2x32xf32>
    %342 = math.tanh %341 : vector<2x32xf32>
    %c0_127 = arith.constant 0 : index
    %c0_128 = arith.constant 0 : index
    %343 = vector.load %arg11[%c0_127, %c0_128] : memref<32x2xf32, #tpu.memory_space<vmem>>, vector<32x2xf32>
    %344 = arith.truncf %342 : vector<2x32xf32> to vector<2x32xbf16>
    %345 = arith.truncf %343 : vector<32x2xf32> to vector<32x2xbf16>
    %cst_129 = arith.constant dense<0.000000e+00> : vector<2x2xf32>
    %346 = tpu.matmul %344, %345, %cst_129 {dimension_numbers = #tpu.dot_dimension_numbers<[1], [0], [0], [1], [0, 0, 1, 1], [], []>} : vector<2x32xbf16>, vector<32x2xbf16>, vector<2x2xf32> -> vector<2x2xf32>
    %c15 = arith.constant 15 : index
    %c0_130 = arith.constant 0 : index
    %347 = vector.load %arg12[%c15, %c0_130] : memref<16x32xf32, #tpu.memory_space<vmem>>, vector<1x2xf32>
    %348 = vector.broadcast %347 : vector<1x2xf32> to vector<2x2xf32>
    %349 = arith.addf %346, %348 : vector<2x2xf32>
    %c0_131 = arith.constant 0 : index
    %c0_132 = arith.constant 0 : index
    %350 = vector.load %arg13[%c0_131, %c0_132] : memref<2x2xf32, #tpu.memory_space<vmem>>, vector<2x2xf32>
    tpu.vector_store %arg13[%c0_131, %c0_132], %349 {strides = array<i32>} : memref<2x2xf32, #tpu.memory_space<vmem>>, vector<2x2xf32>,
    return
  }
}

</mosaic_0001>

<bundles_post_ra>
// kernel: tpu_custom_call.1
= control target key start
LH: loop header
LB: loop body
LE: loop exit
PB: predicated region body
PF: predicated region fallthrough
CT: control target
= control target key end

     0   :  { %v1959_v1 = vmov 0   ;;  %v1960_v2 = vmov 0.0   ;;  %s2555_s0 = inlined_call_operand.vmem [shape: s32[16,1], index: 0, kind: input, shape index: {}]   ;;  %s2556_s1 = inlined_call_operand.vmem [shape: f32[1,16], index: 1, kind: input, shape index: {}]   ;;  %s2557_s2 = inlined_call_operand.vmem [shape: f32[128,32], index: 2, kind: input, shape index: {}]   ;;  %s2558_s3 = inlined_call_operand.vmem [shape: f32[16,32], index: 3, kind: input, shape index: {}]   ;;  %s2559_s4 = inlined_call_operand.vmem [shape: f32[2,32,96], index: 4, kind: input, shape index: {}]   ;;  %s2560_s5 = inlined_call_operand.vmem [shape: f32[2,1,96], index: 5, kind: input, shape index: {}]   ;;  %s2561_s6 = inlined_call_operand.vmem [shape: f32[2,32,32], index: 6, kind: input, shape index: {}]   ;;  %s2562_s7 = inlined_call_operand.vmem [shape: f32[2,32,64], index: 7, kind: input, shape index: {}]   ;;  %s2563_s8 = inlined_call_operand.vmem [shape: f32[2,1,64], index: 8, kind: input, shape index: {}]   ;;  %s2564_s9 = inlined_call_operand.vmem [shape: f32[2,64,32], index: 9, kind: input, shape index: {}]   ;;  %s2565_s10 = inlined_call_operand.vmem [shape: f32[32,32], index: 10, kind: input, shape index: {}]   ;;  %s2566_s11 = inlined_call_operand.vmem [shape: f32[32,2], index: 11, kind: input, shape index: {}]   ;;  %s2567_s12 = inlined_call_operand.vmem [shape: f32[16,32], index: 12, kind: input, shape index: {}]   ;;  %s2568_s13 = inlined_call_operand.hbm [shape: f32[2,2], index: 13, kind: output, shape index: {}]  }
   0x1   :  { %v46_v0 = vld [vmem:[%s2555_s0] sm:$0xff]  ;;  %1862 = vset.pattern.permute.xlu0 %v1959_v1  ;;  %1688 = vmatprep.subr.bf16.mxu0 %v1960_v2  ;;  %v59_v4 = vld [vmem:[%s2557_s2 + $0x8] sm:$0xff]  ;;  %v60_v5 = vld [vmem:[%s2557_s2 + $0x10] sm:$0xff] }
   0x2   :  { %v58_v3 = vld [vmem:[%s2557_s2] sm:$0xff]  ;;  %51 = vperm.xlu0 %1862, %v46_v0   ;;  %v61_v7 = vld [vmem:[%s2557_s2 + $0x18] sm:$0xff]  ;;  %1708 = vmatprep.subr.bf16.mxu1 %v1960_v2  ;;  %v47_v8 = vld [vmem:[%s2555_s0 + $0x8] sm:$0xff] }
   0x3   :  { %v79_v6 = vpack.c.bf16 %v59_v4, %v58_v3  ;;  %v80_v9 = vpack.c.bf16 %v61_v7, %v60_v5  ;;  %v62_v10 = vld [vmem:[%s2557_s2 + $0x20] sm:$0xff]  ;;  %v63_v11 = vld [vmem:[%s2557_s2 + $0x28] sm:$0xff] }
   0x5   :  { %1689 = vmatpush3.bf16.msra.mxu0 %v79_v6 }
   0x6   :  { %1690 = vmatprep.subr.bf16.mxu0 %v1960_v2  ;;  %54 = vperm.xlu0 %1862, %v47_v8  }
   0x7   :  { %18 = vsyncpa [#allocation3], 0  ;;  %v81_v12 = vpack.c.bf16 %v63_v11, %v62_v10  ;;  %vm1961_vm0 = vmmov 0   ;;  %v64_v13 = vld [vmem:[%s2557_s2 + $0x30] sm:$0xff]  ;;  %v65_v14 = vld [vmem:[%s2557_s2 + $0x38] sm:$0xff]  ;;  %v48_v28 = vlaneseq  ;;  %vm132_vm4 = vcmask 261120  }
   0x8   :  { %1704 = vmatprep.mubr.msk.bf16.mxu0 %vm1961_vm0, %v1960_v2  ;;  %1712 = vmatprep.mubr.msk.bf16.mxu1 %vm1961_vm0, %v1960_v2  ;;  %v82_v15 = vpack.c.bf16 %v65_v14, %v64_v13  ;;  %v66_v16 = vld [vmem:[%s2557_s2 + $0x40] sm:$0xff]  ;;  %v67_v17 = vld [vmem:[%s2557_s2 + $0x48] sm:$0xff]  ;;  %v68_v19 = vld [vmem:[%s2557_s2 + $0x50] sm:$0xff]  ;;  %v1962_v32 = vmov 1.0|1.0   ;;  %s1963_s0 = smov 96  }
   0x9   :  { %1691 = vmatpush3.bf16.msra.mxu0 %v80_v9  ;;  %v83_v18 = vpack.c.bf16 %v67_v17, %v66_v16  ;;  %v69_v20 = vld [vmem:[%s2557_s2 + $0x58] sm:$0xff]  ;;  %v70_v22 = vld [vmem:[%s2557_s2 + $0x60] sm:$0xff]  ;;  %v71_v23 = vld [vmem:[%s2557_s2 + $0x68] sm:$0xff]  ;;  %v2111_v30 = vand.u32 127, %v48_v28  ;;  %vm263_vm5 = vcmask 130048   ;;  %s1966_s25 = smov 64  }
   0xa   :  { %1692 = vmatprep.subr.bf16.mxu0 %v1960_v2  ;;  %v84_v21 = vpack.c.bf16 %v69_v20, %v68_v19  ;;  %v85_v24 = vpack.c.bf16 %v71_v23, %v70_v22  ;;  %v72_v25 = vld [vmem:[%s2557_s2 + $0x70] sm:$0xff]  ;;  %v73_v26 = vld [vmem:[%s2557_s2 + $0x78] sm:$0xff]  ;;  %v87_v33 = vld [vmem:[%s2558_s3] sm:$0xff]  ;;  %s1967_s26 = smov 112   ;;  %s1968_s27 = smov 48   ;;  %vm704_vm12 = vcmask 523264  }
   0xb   :  { %v86_v27 = vpack.c.bf16 %v73_v26, %v72_v25  ;;  %v88_v35 = vld [vmem:[%s2558_s3 + $0x8] sm:$0xff]  ;;  %v201_v53 = vld [vmem:[%s2559_s4] sm:$0xff]  ;;  %v203_v56 = vld [vmem:[%s2559_s4 + $0x10] sm:$0xff]  ;;  %s1969_s18 = smov 16   ;;  %vm1545_vm14 = vcmask 9216  }
   0xc   :  { %v202_v54 = vld [vmem:[%s2559_s4 + $0x8] sm:$0xff]  ;;  %v204_v57 = vld [vmem:[%s2559_s4 + $0x18] sm:$0xff]  ;;  %v1565_v5 = vld [vmem:[%s2567_s12] ss:$0 sm:$0xff] }
   0xd   :  { %1693 = vmatpush3.bf16.msra.mxu0 %v81_v12  ;;  %v206_v55 = vpack.c.bf16 %v202_v54, %v201_v53  ;;  %v207_v58 = vpack.c.bf16 %v204_v57, %v203_v56  ;;  %v1566_v9 = vld [vmem:[%s2567_s12 + $0x1] ss:$0 sm:$0xff]  ;;  %v1567_v14 = vld [vmem:[%s2560_s5] ss:$0 sm:$0xff] }
   0xe   :  { %1694 = vmatprep.subr.bf16.mxu0 %v1960_v2 }
   0xf   :  { %1709 = vmatpush3.bf16.msra.mxu1 %v206_v55 }
  0x10   :  { %1710 = vmatprep.subr.bf16.mxu1 %v1960_v2 }
  0x11   :  { %1695 = vmatpush3.bf16.msra.mxu0 %v82_v15 }
  0x12   :  { %1696 = vmatprep.subr.bf16.mxu0 %v1960_v2 }
  0x13   :  { %1711 = vmatpush3.bf16.msra.mxu1 %v207_v58 }
  0x14   :  { %1716 = vmatprep.subr.bf16.mxu1 %v1960_v2 }
  0x15   :  { %1697 = vmatpush3.bf16.msra.mxu0 %v83_v18 }
  0x16   :  { %1698 = vmatprep.subr.bf16.mxu0 %v1960_v2 }
  0x19   :  { %1699 = vmatpush3.bf16.msra.mxu0 %v84_v21 }
  0x1a   :  { %1700 = vmatprep.subr.bf16.mxu0 %v1960_v2 }
  0x1d   :  { %1701 = vmatpush3.bf16.msra.mxu0 %v85_v24  ;;  %v2170_v24 = vshrl.u32 %v48_v28, 7 }
  0x1e   :  { %1702 = vmatprep.subr.bf16.mxu0 %v1960_v2 }
  0x1f   :  { %v174_v25 = vadd.s32 8, %v2170_v24  ;;  %v175_v26 = vcvt.s32.f32 %v2170_v24  ;;  %v194_v28 = vsub.s32 0, %v2170_v24 }
  0x21   :  { %1703 = vmatpush3.bf16.msra.mxu0 %v86_v27  ;;  %v183_v27 = vcvt.s32.f32 %v2111_v30 }
  0x22   :  { %1734 = vmatprep.subr.bf16.mxu0 %v1960_v2 }
  0x81   :  { %v52_v29 = vpop.permute.xlu0 %51 }
  0x82   :  { %vm56_vm1 = vcmp.eq.s32.totalorder %v52_v29, %v2111_v30  ;;  %v176_v29 = vcvt.s32.f32 %v174_v25 }
  0x85   :  { %v55_v31 = vpop.permute.xlu0 %54 }
  0x86   :  { %vm57_vm2 = vcmp.eq.s32.totalorder %v55_v31, %v2111_v30  ;;  %v187_v31 = vld [vmem:[%s2556_s1] sm:$0x1]  ;;  %s1965_s1 = smov 80  }
  0x87   :  { %vm1563_vm3 = vmpackc.low %vm57_vm2, %vm56_vm1  ;;  %vm188_vm6 = vcmp.gt.f32.partialorder %v187_v31, 0.5 }
  0x88   :  { %1705 = vmatmul.mubr.msk.bf16.vlgmr.msra.gmra.mrb[0].mxu0 %vm1563_vm3, %v1962_v32  ;;  %v177_v32 = vadd.f32 0.5, %v175_v26 }
  0x89   :  { %1736 = vmatprep.mubr.msk.bf16.mxu0 %vm1961_vm0, %v1960_v2 }
 0x15b   :  { %v123_v34 = vpop.f32.mrb[0].mxu0 }
 0x15c   :  { %v124_v36 = vadd.f32 %v123_v34, %v87_v33  ;;  %v1706_v37 = vpop.f32.mrb[1].mxu0  ;;  %v184_v33 = vadd.f32 0.5, %v183_v27  ;;  %v178_v34 = vadd.f32 0.5, %v176_v29 }
 0x15d   :  { %v126_v38 = vpop.f32.mrb[2].mxu0  ;;  %v191_v37 = vsel %vm188_vm6, 1, %v1959_v1 }
 0x15e   :  { %v127_v39 = vadd.f32 %v126_v38, %v88_v35  ;;  %v1707_v40 = vpop.f32.mrb[3].mxu0  ;;  %v133_v41 = vsel %vm132_vm4, %v124_v36, 0.0  ;;  %v179_v35 = vmul.f32 0.125, %v177_v32  ;;  %v180_v38 = vmul.f32 0.125, %v178_v34 }
 0x15f   :  { %134 = vadd.xlane.f32.xlu1 %v133_v41  ;;  %v195_v41 = vrot.slane %v191_v37, %v194_v28 }
 0x160   :  { %v136_v42 = vsel %vm132_vm4, %v127_v39, 0.0 }
 0x161   :  { %vm196_vm8 = vcmp.eq.s32.totalorder %v195_v41, 1 }
 0x163   :  { %137 = vadd.xlane.f32.xlu1 %v136_v42  ;;  %v182_v42 = vfloor.f32 %v180_v38 }
 0x1ec   :  { %v135_v43 = vpop.xlane.xlu1 %134 }
 0x1ed   :  { %v140_v44 = vmul.f32 0.03125, %v135_v43  ;;  %v1964_v43 = vmov -1e+09  }
 0x1ef   :  { %v142_v45 = vsub.f32 %v124_v36, %v140_v44  ;;  %v185_v36 = vmul.f32 0.125, %v184_v33 }
 0x1f0   :  { %v138_v46 = vpop.xlane.xlu1 %137 }
 0x1f1   :  { %v141_v47 = vmul.f32 0.03125, %v138_v46  ;;  %v144_v48 = vmul.f32 %v142_v45, %v142_v45  ;;  %v186_v40 = vfloor.f32 %v185_v36 }
 0x1f3   :  { %v143_v49 = vsub.f32 %v127_v39, %v141_v47  ;;  %v146_v50 = vsel %vm132_vm4, %v144_v48, 0.0  ;;  %v181_v39 = vfloor.f32 %v179_v35  ;;  %vm190_vm9 = vcmp.eq.f32.partialorder %v182_v42, %v186_v40 }
 0x1f4   :  { %147 = vadd.xlane.f32.xlu0 %v146_v50  ;;  %vm198_vm11 = vmand %vm190_vm9, %vm196_vm8 }
 0x1f5   :  { %v145_v51 = vmul.f32 %v143_v49, %v143_v49  ;;  %vm189_vm7 = vcmp.eq.f32.partialorder %v181_v39, %v186_v40  ;;  %v2182_v46 = vsel %vm198_vm11, 0.0, %v1964_v43 }
 0x1f6   :  { %vm197_vm10 = vmand %vm189_vm7, %vm196_vm8 }
 0x1f7   :  { %v149_v52 = vsel %vm132_vm4, %v145_v51, 0.0  ;;  %v2180_v44 = vsel %vm197_vm10, 0.0, %v1964_v43 }
 0x1f8   :  { %150 = vadd.xlane.f32.xlu1 %v149_v52 }
 0x281   :  { %v148_v59 = vpop.xlane.xlu0 %147 }
 0x282   :  { %v152_v60 = vmul.f32 0.03125, %v148_v59 }
 0x284   :  { %v154_v61 = vadd.f32 1e-12, %v152_v60 }
 0x285   :  { %v151_v62 = vpop.xlane.xlu1 %150 }
 0x286   :  { %1873 = vrsqrt.f32 %v154_v61  ;;  %v153_v63 = vmul.f32 0.03125, %v151_v62 }
 0x288   :  { %v155_v0 = vadd.f32 1e-12, %v153_v63 }
 0x28a   :  { %1875 = vrsqrt.f32 %v155_v0 }
 0x290   :  { %v1874_v3 = vpop.eup %1873 }
 0x291   :  { %v158_v4 = vmul.f32 %v1874_v3, %v142_v45 }
 0x293   :  { %v164_v8 = vmul.f32 %v1565_v5, %v158_v4 }
 0x294   :  { %v1876_v6 = vpop.eup %1875 }
 0x295   :  { %v159_v7 = vmul.f32 %v1876_v6, %v143_v49  ;;  %v2147_v11 = vadd.f32 %v1566_v9, %v164_v8 }
 0x297   :  { %v165_v10 = vmul.f32 %v1565_v5, %v159_v7 }
 0x299   :  { %v2149_v12 = vadd.f32 %v1566_v9, %v165_v10 }
 0x29b   :  { %v205_v13 = vpack.c.bf16 %v2149_v12, %v2147_v11 }
 0x29d   :  { %1713 = vmatmul.mubr.msk.bf16.vlgmr.msra.gmra.mrb[0].mxu1 %vm132_vm4, %v205_v13 }
 0x29e   :  { %1718 = vmatprep.mubr.msk.bf16.mxu1 %vm1961_vm0, %v1960_v2 }
 0x370   :  { %v252_v15 = vpop.f32.mrb[0].mxu1 }
 0x371   :  { %v1714_v16 = vpop.f32.mrb[1].mxu1  ;;  %v253_v18 = vadd.f32 %v1567_v14, %v252_v15 }
 0x372   :  { %v255_v17 = vpop.f32.mrb[2].mxu1 }
 0x373   :  { %v256_v19 = vadd.f32 %v1567_v14, %v255_v17  ;;  %v1715_v20 = vpop.f32.mrb[3].mxu1 }
 0x375   :  { %v2159_v21 = vpack.c.bf16 %v256_v19, %v253_v18 }
 0x377   :  { %261 = vrot.lane.b32.xlu1 %v2159_v21, %s1963_s0 }
 0x3e9   :  { %v262_v22 = vpop.permute.xlu1 %261 }
 0x3ea   :  { %v268_v23 = vsel %vm263_vm5, %v262_v22, 0 }
 0x3eb   :  { %1717 = vmatpush3.bf16.xpose.msra.mxu1 %v268_v23 }
 0x3ec   :  { %1722 = vmatprep.subr.bf16.mxu1 %v1960_v2 }
 0x3f2   :  { %1719 = vmatmul.mubr.msk.bf16.vlgmr.msra.gmra.mrb[4].mxu1 %vm263_vm5, %v2159_v21 }
 0x3f3   :  { %1724 = vmatprep.mubr.msk.bf16.mxu1 %vm1961_vm0, %v1960_v2 }
 0x4c5   :  { %v304_v45 = vpop.f32.mrb[4].mxu1 }
 0x4c6   :  { %v305_v47 = vadd.f32 %v304_v45, %v2180_v44  ;;  %v1720_v48 = vpop.f32.mrb[5].mxu1 }
 0x4c7   :  { %v307_v1 = vpop.f32.mrb[6].mxu1 }
 0x4c8   :  { %v308_v49 = vadd.f32 %v307_v1, %v2182_v46  ;;  %v1721_v50 = vpop.f32.mrb[7].mxu1  ;;  %v311_v51 = vsel %vm263_vm5, %v305_v47, -inf  ;;  %v513_v1 = vld [vmem:[%s2561_s6 + $0x8] sm:$0xff] }
 0x4c9   :  { %312 = vmax.xlane.f32.xlu1 %v311_v51  ;;  %v514_v50 = vld [vmem:[%s2561_s6 + $0x10] sm:$0xff]  ;;  %v515_v51 = vld [vmem:[%s2561_s6 + $0x18] sm:$0xff] }
 0x4ca   :  { %v314_v52 = vsel %vm263_vm5, %v308_v49, -inf }
 0x4cb   :  { %315 = vmax.xlane.f32.xlu0 %v314_v52  ;;  %v518_v52 = vpack.c.bf16 %v515_v51, %v514_v50  ;;  %v687_v50 = vld [vmem:[%s2564_s9 + $0x8] sm:$0xff] }
 0x4da   :  { %383 = vrot.lane.b32.xlu1 %v2159_v21, %s1965_s1 }
 0x556   :  { %v313_v53 = vpop.xlane.xlu1 %312 }
 0x557   :  { %v317_v54 = vsub.f32 %v305_v47, %v313_v53 }
 0x558   :  { %v316_v55 = vpop.xlane.xlu0 %315 }
 0x559   :  { %v319_v56 = vmul.f32 1.442695, %v317_v54  ;;  %v318_v57 = vsub.f32 %v308_v49, %v316_v55 }
 0x55a   :  { %v384_v8 = vpop.permute.xlu1 %383 }
 0x55b   :  { %1877 = vpow2.f32 %v319_v56  ;;  %v321_v58 = vmul.f32 1.442695, %v318_v57  ;;  %v389_v10 = vsel %vm263_vm5, %v384_v8, 0 }
 0x55d   :  { %1879 = vpow2.f32 %v321_v58 }
 0x565   :  { %v1878_v59 = vpop.eup %1877 }
 0x566   :  { %v323_v60 = vsel %vm263_vm5, %v1878_v59, 0.0 }
 0x567   :  { %v1880_v61 = vpop.eup %1879  ;;  %324 = vadd.xlane.f32.xlu0 %v323_v60 }
 0x568   :  { %v326_v62 = vsel %vm263_vm5, %v1880_v61, 0.0 }
 0x56b   :  { %327 = vadd.xlane.f32.xlu0 %v326_v62 }
 0x581   :  { %334 = vrot.lane.b32.xlu0 %v2159_v21, %s1966_s25 }
 0x585   :  { %381 = vrot.lane.b32.xlu0 %v2159_v21, %s1967_s26 }
 0x5f4   :  { %v325_v63 = vpop.xlane.xlu0 %324 }
 0x5f5   :  { %1881 = vrcp.f32 %v325_v63 }
 0x5f8   :  { %v328_v0 = vpop.xlane.xlu0 %327 }
 0x5f9   :  { %1883 = vrcp.f32 %v328_v0  ;;  %v1573_v0 = vld [vmem:[%s2567_s12 + $0x2] ss:$0 sm:$0xff] }
 0x5fc   :  { %v335_v3 = vpop.permute.xlu0 %334 }
 0x5fd   :  { %1723 = vmatpush3.bf16.msra.mxu1 %v335_v3 }
 0x5fe   :  { %1728 = vmatprep.subr.bf16.mxu1 %v1960_v2 }
 0x5ff   :  { %v1882_v4 = vpop.eup %1881 }
 0x600   :  { %v331_v6 = vmul.f32 %v1882_v4, %v1878_v59  ;;  %v382_v13 = vpop.permute.xlu0 %381 }
 0x603   :  { %v1884_v5 = vpop.eup %1883 }
 0x604   :  { %v332_v7 = vmul.f32 %v1884_v5, %v1880_v61 }
 0x606   :  { %v333_v9 = vpack.c.bf16 %v332_v7, %v331_v6 }
 0x608   :  { %1725 = vmatmul.mubr.msk.bf16.vlgmr.msra.gmra.mrb[8].mxu1 %vm263_vm5, %v333_v9 }
 0x609   :  { %1729 = vmatpush3.bf16.xpose.msra.mxu1 %v389_v10  ;;  %1730 = vmatprep.mubr.msk.bf16.mxu1 %vm1961_vm0, %v1960_v2 }
 0x60a   :  { %1740 = vmatprep.subr.bf16.mxu1 %v1960_v2 }
 0x610   :  { %1731 = vmatmul.mubr.msk.bf16.vlgmr.msra.gmra.mrb[12].mxu1 %vm263_vm5, %v382_v13 }
 0x611   :  { %1744 = vmatprep.mubr.msk.bf16.mxu1 %vm1961_vm0, %v1960_v2 }
 0x6db   :  { %v2205_v14 = vpop.f32.mrb[8].mxu1 }
 0x6dc   :  { %v1726_v15 = vpop.f32.mrb[9].mxu1 }
 0x6dd   :  { %v2207_v16 = vpop.f32.mrb[10].mxu1 }
 0x6de   :  { %v1727_v17 = vpop.f32.mrb[11].mxu1 }
 0x6e3   :  { %v425_v18 = vpop.f32.mrb[12].mxu1 }
 0x6e4   :  { %v426_v19 = vadd.f32 %v425_v18, %v2180_v44  ;;  %v1732_v20 = vpop.f32.mrb[13].mxu1 }
 0x6e5   :  { %v428_v22 = vpop.f32.mrb[14].mxu1 }
 0x6e6   :  { %v429_v23 = vadd.f32 %v428_v22, %v2182_v46  ;;  %v1733_v25 = vpop.f32.mrb[15].mxu1  ;;  %v432_v26 = vsel %vm263_vm5, %v426_v19, -inf }
 0x6e7   :  { %433 = vmax.xlane.f32.xlu0 %v432_v26  ;;  %v611_v26 = vld [vmem:[%s2562_s7 + $0x8] sm:$0xff] }
 0x6e8   :  { %v435_v27 = vsel %vm263_vm5, %v429_v23, -inf }
 0x6e9   :  { %436 = vmax.xlane.f32.xlu1 %v435_v27 }
 0x774   :  { %v434_v29 = vpop.xlane.xlu0 %433 }
 0x775   :  { %v438_v31 = vsub.f32 %v426_v19, %v434_v29  ;;  %v612_v29 = vld [vmem:[%s2562_s7 + $0x10] sm:$0xff] }
 0x776   :  { %v437_v32 = vpop.xlane.xlu1 %436 }
 0x777   :  { %v440_v33 = vmul.f32 1.442695, %v438_v31  ;;  %v439_v34 = vsub.f32 %v429_v23, %v437_v32  ;;  %v613_v31 = vld [vmem:[%s2562_s7 + $0x18] sm:$0xff] }
 0x778   :  { %v616_v32 = vpack.c.bf16 %v613_v31, %v612_v29 }
 0x779   :  { %1885 = vpow2.f32 %v440_v33  ;;  %v442_v35 = vmul.f32 1.442695, %v439_v34 }
 0x77b   :  { %1887 = vpow2.f32 %v442_v35 }
 0x783   :  { %v1886_v36 = vpop.eup %1885 }
 0x784   :  { %v444_v28 = vsel %vm263_vm5, %v1886_v36, 0.0 }
 0x785   :  { %v1888_v37 = vpop.eup %1887  ;;  %445 = vadd.xlane.f32.xlu0 %v444_v28 }
 0x786   :  { %v447_v38 = vsel %vm263_vm5, %v1888_v37, 0.0 }
 0x789   :  { %448 = vadd.xlane.f32.xlu0 %v447_v38 }
 0x79f   :  { %455 = vrot.lane.b32.xlu0 %v2159_v21, %s1968_s27  ;;  %v512_v21 = vld [vmem:[%s2561_s6] sm:$0xff] }
 0x7a0   :  { %v517_v49 = vpack.c.bf16 %v513_v1, %v512_v21 }
 0x7a2   :  { %1741 = vmatpush3.bf16.msra.mxu1 %v517_v49  ;;  %v686_v49 = vld [vmem:[%s2564_s9] sm:$0xff] }
 0x7a3   :  { %1742 = vmatprep.subr.bf16.mxu1 %v1960_v2  ;;  %v695_v51 = vpack.c.bf16 %v687_v50, %v686_v49  ;;  %v1584_v50 = vld [vmem:[%s2559_s4 + $0x28] sm:$0xff] }
 0x7a6   :  { %1743 = vmatpush3.bf16.msra.mxu1 %v518_v52  ;;  %v688_v52 = vld [vmem:[%s2564_s9 + $0x10] sm:$0xff] }
 0x7a7   :  { %1756 = vmatprep.subr.bf16.mxu1 %v1960_v2 }
 0x812   :  { %v446_v39 = vpop.xlane.xlu0 %445 }
 0x813   :  { %1889 = vrcp.f32 %v446_v39  ;;  %v1575_v39 = vld [vmem:[%s2567_s12 + $0x3] ss:$0 sm:$0xff] }
 0x816   :  { %v449_v40 = vpop.xlane.xlu0 %448 }
 0x817   :  { %1891 = vrcp.f32 %v449_v40 }
 0x81a   :  { %v456_v41 = vpop.permute.xlu0 %455 }
 0x81b   :  { %1735 = vmatpush3.bf16.msra.mxu0 %v456_v41 }
 0x81c   :  { %1748 = vmatprep.subr.bf16.mxu0 %v1960_v2 }
 0x81d   :  { %v1890_v42 = vpop.eup %1889 }
 0x81e   :  { %v452_v45 = vmul.f32 %v1890_v42, %v1886_v36 }
 0x821   :  { %v1892_v43 = vpop.eup %1891 }
 0x822   :  { %v453_v47 = vmul.f32 %v1892_v43, %v1888_v37 }
 0x824   :  { %v454_v48 = vpack.c.bf16 %v453_v47, %v452_v45  ;;  %v1576_v45 = vld [vmem:[%s2567_s12 + $0x4] ss:$0 sm:$0xff] }
 0x826   :  { %1737 = vmatmul.mubr.msk.bf16.vlgmr.msra.gmra.mrb[4].mxu0 %vm263_vm5, %v454_v48 }
 0x827   :  { %1752 = vmatprep.mubr.msk.bf16.mxu0 %vm1961_vm0, %v1960_v2 }
 0x8f9   :  { %v495_v53 = vpop.f32.mrb[4].mxu0 }
 0x8fa   :  { %v1738_v54 = vpop.f32.mrb[5].mxu0 }
 0x8fb   :  { %v498_v55 = vpop.f32.mrb[6].mxu0 }
 0x8fc   :  { %v1863_v56 = vpack.i.bf16 %v498_v55, %v495_v53  ;;  %v1739_v57 = vpop.f32.mrb[7].mxu0  ;;  %v689_v53 = vld [vmem:[%s2564_s9 + $0x18] sm:$0xff]  ;;  %v690_v55 = vld [vmem:[%s2564_s9 + $0x20] sm:$0xff] }
 0x8fd   :  { %v696_v54 = vpack.c.bf16 %v689_v53, %v688_v52  ;;  %v1585_v52 = vld [vmem:[%s2559_s4 + $0x30] sm:$0xff]  ;;  %v1586_v53 = vld [vmem:[%s2559_s4 + $0x38] sm:$0xff] }
 0x8fe   :  { %1864 = vrot.lane.b32.xlu1 %v1863_v56, %s1969_s18  ;;  %v691_v56 = vld [vmem:[%s2564_s9 + $0x28] sm:$0xff] }
 0x8ff   :  { %v697_v57 = vpack.c.bf16 %v691_v56, %v690_v55 }
 0x970   :  { %v1865_v58 = vpop.permute.xlu1 %1864 }
 0x971   :  { %v1867_v59 = vunpack.i.h.bf16 %v1865_v58  ;;  %v1866_v60 = vunpack.i.l.bf16 %v1865_v58  ;;  %v692_v58 = vld [vmem:[%s2564_s9 + $0x30] sm:$0xff] }
 0x973   :  { %v511_v61 = vsel %vm263_vm5, %v2207_v16, %v1867_v59  ;;  %v510_v62 = vsel %vm263_vm5, %v2205_v14, %v1866_v60  ;;  %v693_v59 = vld [vmem:[%s2564_s9 + $0x38] sm:$0xff] }
 0x974   :  { %v516_v63 = vpack.c.bf16 %v511_v61, %v510_v62  ;;  %v698_v60 = vpack.c.bf16 %v693_v59, %v692_v58  ;;  %v1577_v61 = vld [vmem:[%s2563_s8] ss:$0 sm:$0xff] }
 0x976   :  { %1745 = vmatmul.mubr.msk.bf16.vlgmr.msra.gmra.mrb[16].mxu1 %vm132_vm4, %v516_v63 }
 0x977   :  { %1764 = vmatprep.mubr.msk.bf16.mxu1 %vm1961_vm0, %v1960_v2  ;;  %1757 = vmatpush3.bf16.msra.mxu1 %v695_v51 }
 0x978   :  { %1758 = vmatprep.subr.bf16.mxu1 %v1960_v2 }
 0x97b   :  { %1759 = vmatpush3.bf16.msra.mxu1 %v696_v54  ;;  %v798_v54 = vpack.c.bf16 %v1586_v53, %v1585_v52 }
 0x97c   :  { %1760 = vmatprep.subr.bf16.mxu1 %v1960_v2 }
 0x97f   :  { %1761 = vmatpush3.bf16.msra.mxu1 %v697_v57 }
 0x980   :  { %1762 = vmatprep.subr.bf16.mxu1 %v1960_v2 }
 0x983   :  { %1763 = vmatpush3.bf16.msra.mxu1 %v698_v60 }
 0x984   :  { %1782 = vmatprep.subr.bf16.mxu1 %v1960_v2 }
 0xa49   :  { %v561_v3 = vpop.f32.mrb[16].mxu1 }
 0xa4a   :  { %v562_v4 = vadd.f32 %v1573_v0, %v561_v3  ;;  %v1746_v5 = vpop.f32.mrb[17].mxu1 }
 0xa4b   :  { %v564_v6 = vpop.f32.mrb[18].mxu1 }
 0xa4c   :  { %v565_v7 = vadd.f32 %v1573_v0, %v564_v6  ;;  %v1747_v8 = vpop.f32.mrb[19].mxu1  ;;  %v570_v9 = vadd.f32 %v562_v4, %v2147_v11 }
 0xa4e   :  { %v572_v10 = vsel %vm132_vm4, %v570_v9, 0.0  ;;  %v571_v13 = vadd.f32 %v565_v7, %v2149_v12  ;;  %v610_v12 = vld [vmem:[%s2562_s7] sm:$0xff] }
 0xa4f   :  { %573 = vadd.xlane.f32.xlu1 %v572_v10  ;;  %v615_v27 = vpack.c.bf16 %v611_v26, %v610_v12 }
 0xa50   :  { %v575_v14 = vsel %vm132_vm4, %v571_v13, 0.0 }
 0xa51   :  { %576 = vadd.xlane.f32.xlu0 %v575_v14  ;;  %1749 = vmatpush3.bf16.msra.mxu0 %v615_v27  ;;  %v1579_v27 = vld [vmem:[%s2567_s12 + $0x5] ss:$0 sm:$0xff] }
 0xa52   :  { %1750 = vmatprep.subr.bf16.mxu0 %v1960_v2 }
 0xa55   :  { %1751 = vmatpush3.bf16.msra.mxu0 %v616_v32 }
 0xa56   :  { %1768 = vmatprep.subr.bf16.mxu0 %v1960_v2 }
 0xadc   :  { %v574_v15 = vpop.xlane.xlu1 %573 }
 0xadd   :  { %v578_v16 = vmul.f32 0.03125, %v574_v15 }
 0xade   :  { %v577_v17 = vpop.xlane.xlu0 %576 }
 0xadf   :  { %v580_v18 = vsub.f32 %v570_v9, %v578_v16  ;;  %v579_v19 = vmul.f32 0.03125, %v577_v17 }
 0xae1   :  { %v581_v20 = vsub.f32 %v571_v13, %v579_v19  ;;  %v582_v22 = vmul.f32 %v580_v18, %v580_v18 }
 0xae3   :  { %v584_v23 = vsel %vm132_vm4, %v582_v22, 0.0  ;;  %v583_v25 = vmul.f32 %v581_v20, %v581_v20 }
 0xae4   :  { %585 = vadd.xlane.f32.xlu0 %v584_v23 }
 0xae5   :  { %v587_v11 = vsel %vm132_vm4, %v583_v25, 0.0 }
 0xae6   :  { %588 = vadd.xlane.f32.xlu1 %v587_v11 }
 0xb71   :  { %v586_v33 = vpop.xlane.xlu0 %585 }
 0xb72   :  { %v590_v34 = vmul.f32 0.03125, %v586_v33 }
 0xb73   :  { %v589_v35 = vpop.xlane.xlu1 %588 }
 0xb74   :  { %v592_v36 = vadd.f32 1e-12, %v590_v34  ;;  %v591_v28 = vmul.f32 0.03125, %v589_v35 }
 0xb76   :  { %1893 = vrsqrt.f32 %v592_v36  ;;  %v593_v37 = vadd.f32 1e-12, %v591_v28 }
 0xb78   :  { %1895 = vrsqrt.f32 %v593_v37 }
 0xb80   :  { %v1894_v38 = vpop.eup %1893 }
 0xb81   :  { %v596_v40 = vmul.f32 %v1894_v38, %v580_v18 }
 0xb82   :  { %v1896_v41 = vpop.eup %1895 }
 0xb83   :  { %v602_v42 = vmul.f32 %v1575_v39, %v596_v40  ;;  %v597_v43 = vmul.f32 %v1896_v41, %v581_v20 }
 0xb85   :  { %v603_v47 = vmul.f32 %v1575_v39, %v597_v43  ;;  %v2272_v48 = vadd.f32 %v1576_v45, %v602_v42 }
 0xb87   :  { %v2274_v21 = vadd.f32 %v1576_v45, %v603_v47 }
 0xb89   :  { %v614_v1 = vpack.c.bf16 %v2274_v21, %v2272_v48 }
 0xb8b   :  { %1753 = vmatmul.mubr.msk.bf16.vlgmr.msra.gmra.mrb[8].mxu0 %vm132_vm4, %v614_v1 }
 0xb8c   :  { %1772 = vmatprep.mubr.msk.bf16.mxu0 %vm1961_vm0, %v1960_v2 }
 0xc5e   :  { %v661_v62 = vpop.f32.mrb[8].mxu0 }
 0xc5f   :  { %v662_v63 = vadd.f32 %v1577_v61, %v661_v62  ;;  %v1754_v0 = vpop.f32.mrb[9].mxu0  ;;  %v1581_v62 = vld [vmem:[%s2567_s12 + $0x6] ss:$0 sm:$0xff] }
 0xc60   :  { %v664_v3 = vpop.f32.mrb[10].mxu0 }
 0xc61   :  { %v668_v4 = vmul.f32 %v662_v63, %v662_v63  ;;  %v665_v5 = vadd.f32 %v1577_v61, %v664_v3  ;;  %v1755_v6 = vpop.f32.mrb[11].mxu0 }
 0xc63   :  { %v670_v7 = vmul.f32 %v668_v4, %v662_v63  ;;  %v669_v8 = vmul.f32 %v665_v5, %v665_v5 }
 0xc65   :  { %v672_v9 = vmul.f32 0.044715, %v670_v7  ;;  %v671_v10 = vmul.f32 %v669_v8, %v665_v5 }
 0xc67   :  { %v674_v13 = vadd.f32 %v672_v9, %v662_v63  ;;  %v673_v14 = vmul.f32 0.044715, %v671_v10  ;;  %v1588_v10 = vld [vmem:[%s2560_s5 + $0x1] ss:$0 sm:$0xff] }
 0xc69   :  { %v676_v15 = vmul.f32 0.7978846, %v674_v13  ;;  %v675_v16 = vadd.f32 %v673_v14, %v665_v5 }
 0xc6b   :  { %1897 = vtanh.f32 %v676_v15  ;;  %v677_v17 = vmul.f32 0.7978846, %v675_v16 }
 0xc6d   :  { %1899 = vtanh.f32 %v677_v17 }
 0xc75   :  { %v1898_v18 = vpop.eup %1897 }
 0xc76   :  { %v680_v19 = vadd.f32 1.0, %v1898_v18 }
 0xc77   :  { %v1900_v20 = vpop.eup %1899 }
 0xc78   :  { %v682_v22 = vmul.f32 0.5, %v680_v19  ;;  %v681_v23 = vadd.f32 1.0, %v1900_v20 }
 0xc7a   :  { %v683_v25 = vmul.f32 0.5, %v681_v23  ;;  %v684_v11 = vmul.f32 %v682_v22, %v662_v63 }
 0xc7c   :  { %v685_v12 = vmul.f32 %v683_v25, %v665_v5  ;;  %v1582_v5 = vld [vmem:[%s2567_s12 + $0x7] ss:$0 sm:$0xff] }
 0xc7e   :  { %v694_v26 = vpack.c.bf16 %v685_v12, %v684_v11 }
 0xc80   :  { %1765 = vmatmul.mubr.msk.bf16.vlgmr.msra.gmra.mrb[20].mxu1 %vm704_vm12, %v694_v26 }
 0xc81   :  { %1784 = vmatprep.mubr.msk.bf16.mxu1 %vm1961_vm0, %v1960_v2 }
 0xd53   :  { %v742_v29 = vpop.f32.mrb[20].mxu1 }
 0xd54   :  { %v743_v31 = vadd.f32 %v1579_v27, %v742_v29  ;;  %v1766_v32 = vpop.f32.mrb[21].mxu1 }
 0xd55   :  { %v745_v33 = vpop.f32.mrb[22].mxu1 }
 0xd56   :  { %v746_v34 = vadd.f32 %v1579_v27, %v745_v33  ;;  %v1767_v35 = vpop.f32.mrb[23].mxu1  ;;  %v751_v36 = vadd.f32 %v743_v31, %v2272_v48 }
 0xd58   :  { %v753_v28 = vsel %vm132_vm4, %v751_v36, 0.0  ;;  %v752_v37 = vadd.f32 %v746_v34, %v2274_v21  ;;  %v1583_v21 = vld [vmem:[%s2559_s4 + $0x20] sm:$0xff] }
 0xd59   :  { %754 = vadd.xlane.f32.xlu0 %v753_v28  ;;  %v797_v51 = vpack.c.bf16 %v1584_v50, %v1583_v21 }
 0xd5a   :  { %v756_v38 = vsel %vm132_vm4, %v752_v37, 0.0 }
 0xd5b   :  { %757 = vadd.xlane.f32.xlu1 %v756_v38  ;;  %1769 = vmatpush3.bf16.msra.mxu0 %v797_v51 }
 0xd5c   :  { %1770 = vmatprep.subr.bf16.mxu0 %v1960_v2 }
 0xd5f   :  { %1771 = vmatpush3.bf16.msra.mxu0 %v798_v54 }
 0xd60   :  { %1776 = vmatprep.subr.bf16.mxu0 %v1960_v2 }
 0xde6   :  { %v755_v39 = vpop.xlane.xlu0 %754 }
 0xde7   :  { %v759_v40 = vmul.f32 0.03125, %v755_v39 }
 0xde8   :  { %v758_v41 = vpop.xlane.xlu1 %757 }
 0xde9   :  { %v761_v42 = vsub.f32 %v751_v36, %v759_v40  ;;  %v760_v43 = vmul.f32 0.03125, %v758_v41 }
 0xdeb   :  { %v762_v45 = vsub.f32 %v752_v37, %v760_v43  ;;  %v763_v47 = vmul.f32 %v761_v42, %v761_v42 }
 0xded   :  { %v765_v1 = vsel %vm132_vm4, %v763_v47, 0.0  ;;  %v764_v49 = vmul.f32 %v762_v45, %v762_v45 }
 0xdee   :  { %766 = vadd.xlane.f32.xlu0 %v765_v1 }
 0xdef   :  { %v768_v48 = vsel %vm132_vm4, %v764_v49, 0.0 }
 0xdf0   :  { %769 = vadd.xlane.f32.xlu1 %v768_v48 }
 0xe7b   :  { %v767_v55 = vpop.xlane.xlu0 %766 }
 0xe7c   :  { %v771_v56 = vmul.f32 0.03125, %v767_v55 }
 0xe7d   :  { %v770_v57 = vpop.xlane.xlu1 %769 }
 0xe7e   :  { %v773_v58 = vadd.f32 1e-12, %v771_v56  ;;  %v772_v59 = vmul.f32 0.03125, %v770_v57 }
 0xe80   :  { %1901 = vrsqrt.f32 %v773_v58  ;;  %v774_v60 = vadd.f32 1e-12, %v772_v59 }
 0xe82   :  { %1903 = vrsqrt.f32 %v774_v60 }
 0xe8a   :  { %v1902_v61 = vpop.eup %1901 }
 0xe8b   :  { %v777_v63 = vmul.f32 %v1902_v61, %v761_v42 }
 0xe8c   :  { %v1904_v0 = vpop.eup %1903 }
 0xe8d   :  { %v783_v3 = vmul.f32 %v1581_v62, %v777_v63  ;;  %v778_v4 = vmul.f32 %v1904_v0, %v762_v45 }
 0xe8f   :  { %v784_v6 = vmul.f32 %v1581_v62, %v778_v4  ;;  %v2344_v7 = vadd.f32 %v1582_v5, %v783_v3 }
 0xe91   :  { %v2346_v8 = vadd.f32 %v1582_v5, %v784_v6 }
 0xe93   :  { %v796_v9 = vpack.c.bf16 %v2346_v8, %v2344_v7 }
 0xe95   :  { %1773 = vmatmul.mubr.msk.bf16.vlgmr.msra.gmra.mrb[12].mxu0 %vm132_vm4, %v796_v9 }
 0xe96   :  { %1778 = vmatprep.mubr.msk.bf16.mxu0 %vm1961_vm0, %v1960_v2 }
 0xf68   :  { %v844_v13 = vpop.f32.mrb[12].mxu0 }
 0xf69   :  { %v1774_v14 = vpop.f32.mrb[13].mxu0  ;;  %v845_v16 = vadd.f32 %v1588_v10, %v844_v13 }
 0xf6a   :  { %v847_v15 = vpop.f32.mrb[14].mxu0 }
 0xf6b   :  { %v848_v17 = vadd.f32 %v1588_v10, %v847_v15  ;;  %v1775_v18 = vpop.f32.mrb[15].mxu0 }
 0xf6c   :  { %v1594_v18 = vld [vmem:[%s2561_s6 + $0x20] sm:$0xff] }
 0xf6d   :  { %v2356_v19 = vpack.c.bf16 %v848_v17, %v845_v16 }
 0xf6f   :  { %974 = vrot.lane.b32.xlu1 %v2356_v19, %s1965_s1  ;;  %853 = vrot.lane.b32.xlu0 %v2356_v19, %s1963_s0 }
 0xf73   :  { %972 = vrot.lane.b32.xlu1 %v2356_v19, %s1967_s26 }
 0xfe1   :  { %v854_v20 = vpop.permute.xlu0 %853  ;;  %v975_v23 = vpop.permute.xlu1 %974 }
 0xfe2   :  { %v859_v22 = vsel %vm263_vm5, %v854_v20, 0  ;;  %v980_v25 = vsel %vm263_vm5, %v975_v23, 0 }
 0xfe3   :  { %1777 = vmatpush3.bf16.xpose.msra.mxu0 %v859_v22 }
 0xfe4   :  { %1788 = vmatprep.subr.bf16.mxu0 %v1960_v2 }
 0xfe5   :  { %v973_v11 = vpop.permute.xlu1 %972 }
 0xfea   :  { %1779 = vmatmul.mubr.msk.bf16.vlgmr.msra.gmra.mrb[16].mxu0 %vm263_vm5, %v2356_v19 }
 0xfeb   :  { %1789 = vmatpush3.bf16.xpose.msra.mxu0 %v980_v25  ;;  %1790 = vmatprep.mubr.msk.bf16.mxu0 %vm1961_vm0, %v1960_v2 }
 0xfec   :  { %1800 = vmatprep.subr.bf16.mxu0 %v1960_v2 }
 0xff2   :  { %1791 = vmatmul.mubr.msk.bf16.vlgmr.msra.gmra.mrb[20].mxu0 %vm263_vm5, %v973_v11  ;;  %v1596_v11 = vld [vmem:[%s2561_s6 + $0x30] sm:$0xff] }
 0xff3   :  { %1804 = vmatprep.mubr.msk.bf16.mxu0 %vm1961_vm0, %v1960_v2 }
0x10bd   :  { %v895_v12 = vpop.f32.mrb[16].mxu0 }
0x10be   :  { %v896_v26 = vadd.f32 %v895_v12, %v2180_v44  ;;  %v1780_v27 = vpop.f32.mrb[17].mxu0  ;;  %v1597_v12 = vld [vmem:[%s2561_s6 + $0x38] sm:$0xff] }
0x10bf   :  { %v898_v29 = vpop.f32.mrb[18].mxu0  ;;  %v1110_v27 = vpack.c.bf16 %v1597_v12, %v1596_v11  ;;  %v1611_v12 = vld [vmem:[%s2564_s9 + $0x50] sm:$0xff] }
0x10c0   :  { %v899_v31 = vadd.f32 %v898_v29, %v2182_v46  ;;  %v1781_v32 = vpop.f32.mrb[19].mxu0  ;;  %v902_v33 = vsel %vm263_vm5, %v896_v26, -inf }
0x10c1   :  { %903 = vmax.xlane.f32.xlu0 %v902_v33 }
0x10c2   :  { %v905_v34 = vsel %vm263_vm5, %v899_v31, -inf }
0x10c3   :  { %906 = vmax.xlane.f32.xlu1 %v905_v34 }
0x10c5   :  { %v1016_v35 = vpop.f32.mrb[20].mxu0 }
0x10c6   :  { %v1017_v36 = vadd.f32 %v1016_v35, %v2180_v44  ;;  %v1792_v28 = vpop.f32.mrb[21].mxu0 }
0x10c7   :  { %v1019_v37 = vpop.f32.mrb[22].mxu0 }
0x10c8   :  { %v1020_v38 = vadd.f32 %v1019_v37, %v2182_v46  ;;  %v1793_v39 = vpop.f32.mrb[23].mxu0  ;;  %v1023_v40 = vsel %vm263_vm5, %v1017_v36, -inf }
0x10c9   :  { %1024 = vmax.xlane.f32.xlu0 %v1023_v40  ;;  %v1598_v40 = vld [vmem:[%s2567_s12 + $0x8] ss:$0 sm:$0xff] }
0x10ca   :  { %v1026_v41 = vsel %vm263_vm5, %v1020_v38, -inf }
0x10cd   :  { %1027 = vmax.xlane.f32.xlu0 %v1026_v41 }
0x114e   :  { %v904_v42 = vpop.xlane.xlu0 %903 }
0x114f   :  { %v908_v43 = vsub.f32 %v896_v26, %v904_v42 }
0x1150   :  { %v907_v45 = vpop.xlane.xlu1 %906 }
0x1151   :  { %v910_v47 = vmul.f32 1.442695, %v908_v43  ;;  %v909_v1 = vsub.f32 %v899_v31, %v907_v45 }
0x1153   :  { %1905 = vpow2.f32 %v910_v47  ;;  %v912_v49 = vmul.f32 1.442695, %v909_v1 }
0x1155   :  { %1907 = vpow2.f32 %v912_v49 }
0x1156   :  { %v1025_v44 = vpop.xlane.xlu0 %1024 }
0x1157   :  { %v1029_v48 = vsub.f32 %v1017_v36, %v1025_v44 }
0x1159   :  { %v1031_v21 = vmul.f32 1.442695, %v1029_v48 }
0x115a   :  { %v1028_v50 = vpop.xlane.xlu0 %1027 }
0x115b   :  { %1909 = vpow2.f32 %v1031_v21  ;;  %v1030_v46 = vsub.f32 %v1020_v38, %v1028_v50 }
0x115d   :  { %v1906_v51 = vpop.eup %1905  ;;  %v1033_v52 = vmul.f32 1.442695, %v1030_v46 }
0x115e   :  { %v914_v53 = vsel %vm263_vm5, %v1906_v51, 0.0 }
0x115f   :  { %v1908_v54 = vpop.eup %1907  ;;  %1911 = vpow2.f32 %v1033_v52  ;;  %915 = vadd.xlane.f32.xlu1 %v914_v53 }
0x1160   :  { %v917_v55 = vsel %vm263_vm5, %v1908_v54, 0.0 }
0x1161   :  { %918 = vadd.xlane.f32.xlu0 %v917_v55 }
0x1165   :  { %v1910_v56 = vpop.eup %1909 }
0x1166   :  { %v1035_v57 = vsel %vm263_vm5, %v1910_v56, 0.0 }
0x1167   :  { %1036 = vadd.xlane.f32.xlu1 %v1035_v57 }
0x1169   :  { %v1912_v58 = vpop.eup %1911 }
0x116a   :  { %v1038_v59 = vsel %vm263_vm5, %v1912_v58, 0.0 }
0x116b   :  { %1039 = vadd.xlane.f32.xlu0 %v1038_v59 }
0x1178   :  { %925 = vrot.lane.b32.xlu1 %v2356_v19, %s1966_s25 }
0x1181   :  { %1046 = vrot.lane.b32.xlu0 %v2356_v19, %s1968_s27  ;;  %v1595_v19 = vld [vmem:[%s2561_s6 + $0x28] sm:$0xff] }
0x1182   :  { %v1109_v20 = vpack.c.bf16 %v1595_v19, %v1594_v18 }
0x1184   :  { %1801 = vmatpush3.bf16.msra.mxu0 %v1109_v20 }
0x1185   :  { %1802 = vmatprep.subr.bf16.mxu0 %v1960_v2 }
0x1188   :  { %1803 = vmatpush3.bf16.msra.mxu0 %v1110_v27 }
0x1189   :  { %1816 = vmatprep.subr.bf16.mxu0 %v1960_v2 }
0x11ec   :  { %v916_v60 = vpop.xlane.xlu1 %915 }
0x11ed   :  { %1913 = vrcp.f32 %v916_v60  ;;  %v1604_v60 = vld [vmem:[%s2562_s7 + $0x30] sm:$0xff] }
0x11ee   :  { %v919_v61 = vpop.xlane.xlu0 %918 }
0x11ef   :  { %1915 = vrcp.f32 %v919_v61  ;;  %v1605_v61 = vld [vmem:[%s2562_s7 + $0x38] sm:$0xff] }
0x11f4   :  { %v1037_v62 = vpop.xlane.xlu1 %1036 }
0x11f5   :  { %1917 = vrcp.f32 %v1037_v62  ;;  %v1209_v62 = vpack.c.bf16 %v1605_v61, %v1604_v60 }
0x11f7   :  { %v1914_v63 = vpop.eup %1913 }
0x11f8   :  { %v926_v0 = vpop.permute.xlu1 %925  ;;  %v1040_v3 = vpop.xlane.xlu0 %1039  ;;  %v922_v5 = vmul.f32 %v1914_v63, %v1906_v51 }
0x11f9   :  { %v1916_v4 = vpop.eup %1915  ;;  %1919 = vrcp.f32 %v1040_v3  ;;  %1783 = vmatpush3.bf16.msra.mxu1 %v926_v0 }
0x11fa   :  { %v923_v6 = vmul.f32 %v1916_v4, %v1908_v54  ;;  %1794 = vmatprep.subr.bf16.mxu1 %v1960_v2 }
0x11fc   :  { %v1047_v9 = vpop.permute.xlu0 %1046  ;;  %v924_v10 = vpack.c.bf16 %v923_v6, %v922_v5 }
0x11fe   :  { %1785 = vmatmul.mubr.msk.bf16.vlgmr.msra.gmra.mrb[24].mxu1 %vm263_vm5, %v924_v10  ;;  %v1600_v10 = vld [vmem:[%s2567_s12 + $0x9] ss:$0 sm:$0xff] }
0x11ff   :  { %1795 = vmatpush3.bf16.msra.mxu1 %v1047_v9  ;;  %1796 = vmatprep.mubr.msk.bf16.mxu1 %vm1961_vm0, %v1960_v2  ;;  %v1918_v13 = vpop.eup %1917 }
0x1200   :  { %1808 = vmatprep.subr.bf16.mxu1 %v1960_v2  ;;  %v1043_v15 = vmul.f32 %v1918_v13, %v1910_v56 }
0x1203   :  { %v1920_v14 = vpop.eup %1919 }
0x1204   :  { %v1044_v16 = vmul.f32 %v1920_v14, %v1912_v58  ;;  %v1603_v58 = vld [vmem:[%s2562_s7 + $0x28] sm:$0xff] }
0x1206   :  { %v1045_v17 = vpack.c.bf16 %v1044_v16, %v1043_v15 }
0x1208   :  { %1797 = vmatmul.mubr.msk.bf16.vlgmr.msra.gmra.mrb[28].mxu1 %vm263_vm5, %v1045_v17  ;;  %v1601_v17 = vld [vmem:[%s2567_s12 + $0xa] ss:$0 sm:$0xff] }
0x1209   :  { %1812 = vmatprep.mubr.msk.bf16.mxu1 %vm1961_vm0, %v1960_v2 }
0x12d1   :  { %v965_v22 = vpop.f32.mrb[24].mxu1 }
0x12d2   :  { %v1786_v23 = vpop.f32.mrb[25].mxu1 }
0x12d3   :  { %v968_v25 = vpop.f32.mrb[26].mxu1  ;;  %v1609_v23 = vld [vmem:[%s2564_s9 + $0x40] sm:$0xff] }
0x12d4   :  { %v1787_v26 = vpop.f32.mrb[27].mxu1 }
0x12d5   :  { %v1612_v26 = vld [vmem:[%s2564_s9 + $0x58] sm:$0xff] }
0x12d6   :  { %v1291_v27 = vpack.c.bf16 %v1612_v26, %v1611_v12 }
0x12db   :  { %v1086_v29 = vpop.f32.mrb[28].mxu1 }
0x12dc   :  { %v1798_v31 = vpop.f32.mrb[29].mxu1 }
0x12dd   :  { %v1089_v32 = vpop.f32.mrb[30].mxu1  ;;  %v1614_v31 = vld [vmem:[%s2564_s9 + $0x68] sm:$0xff] }
0x12de   :  { %v1868_v33 = vpack.i.bf16 %v1089_v32, %v1086_v29  ;;  %v1799_v34 = vpop.f32.mrb[31].mxu1  ;;  %v1613_v29 = vld [vmem:[%s2564_s9 + $0x60] sm:$0xff] }
0x12df   :  { %v1292_v32 = vpack.c.bf16 %v1614_v31, %v1613_v29  ;;  %v1616_v34 = vld [vmem:[%s2564_s9 + $0x78] sm:$0xff]  ;;  %v1385_v29 = vmul.u32 8, %v2170_v24  ;;  %v1435_v24 = vld [vmem:[%s2565_s10 + $0x8] sm:$0xff] }
0x12e0   :  { %1869 = vrot.lane.b32.xlu1 %v1868_v33, %s1969_s18  ;;  %v1615_v33 = vld [vmem:[%s2564_s9 + $0x70] sm:$0xff] }
0x12e1   :  { %vm1386_vm13 = vcmp.eq.s32.totalorder %v1385_v29, %v2111_v30  ;;  %v1436_v30 = vld [vmem:[%s2565_s10 + $0x10] sm:$0xff] }
0x1352   :  { %v1870_v35 = vpop.permute.xlu1 %1869 }
0x1353   :  { %v1872_v36 = vunpack.i.h.bf16 %v1870_v35  ;;  %v1871_v28 = vunpack.i.l.bf16 %v1870_v35  ;;  %v1293_v35 = vpack.c.bf16 %v1616_v34, %v1615_v33 }
0x1355   :  { %v1102_v37 = vsel %vm263_vm5, %v968_v25, %v1872_v36  ;;  %v1101_v38 = vsel %vm263_vm5, %v965_v22, %v1871_v28  ;;  %v1610_v25 = vld [vmem:[%s2564_s9 + $0x48] sm:$0xff]  ;;  %v1607_v36 = vld [vmem:[%s2563_s8 + $0x1] ss:$0 sm:$0xff] }
0x1356   :  { %v1108_v39 = vpack.c.bf16 %v1102_v37, %v1101_v38  ;;  %v1290_v11 = vpack.c.bf16 %v1610_v25, %v1609_v23 }
0x1358   :  { %1805 = vmatmul.mubr.msk.bf16.vlgmr.msra.gmra.mrb[24].mxu0 %vm132_vm4, %v1108_v39 }
0x1359   :  { %1824 = vmatprep.mubr.msk.bf16.mxu0 %vm1961_vm0, %v1960_v2  ;;  %1817 = vmatpush3.bf16.msra.mxu0 %v1290_v11 }
0x135a   :  { %1818 = vmatprep.subr.bf16.mxu0 %v1960_v2 }
0x135d   :  { %1819 = vmatpush3.bf16.msra.mxu0 %v1291_v27  ;;  %v1619_v27 = vld [vmem:[%s2567_s12 + $0xc] ss:$0 sm:$0xff] }
0x135e   :  { %1820 = vmatprep.subr.bf16.mxu0 %v1960_v2 }
0x1361   :  { %1821 = vmatpush3.bf16.msra.mxu0 %v1292_v32 }
0x1362   :  { %1822 = vmatprep.subr.bf16.mxu0 %v1960_v2 }
0x1365   :  { %1823 = vmatpush3.bf16.msra.mxu0 %v1293_v35  ;;  %v1620_v35 = vld [vmem:[%s2567_s12 + $0xd] ss:$0 sm:$0xff] }
0x1366   :  { %1842 = vmatprep.subr.bf16.mxu0 %v1960_v2 }
0x142b   :  { %v1153_v41 = vpop.f32.mrb[24].mxu0 }
0x142c   :  { %v1154_v42 = vadd.f32 %v1598_v40, %v1153_v41  ;;  %v1806_v43 = vpop.f32.mrb[25].mxu0 }
0x142d   :  { %v1156_v45 = vpop.f32.mrb[26].mxu0 }
0x142e   :  { %v1157_v47 = vadd.f32 %v1598_v40, %v1156_v45  ;;  %v1807_v1 = vpop.f32.mrb[27].mxu0  ;;  %v1162_v49 = vadd.f32 %v1154_v42, %v2344_v7 }
0x1430   :  { %v1164_v44 = vsel %vm132_vm4, %v1162_v49, 0.0  ;;  %v1163_v48 = vadd.f32 %v1157_v47, %v2346_v8  ;;  %v1602_v8 = vld [vmem:[%s2562_s7 + $0x20] sm:$0xff] }
0x1431   :  { %1165 = vadd.xlane.f32.xlu1 %v1164_v44  ;;  %v1208_v59 = vpack.c.bf16 %v1603_v58, %v1602_v8  ;;  %v1617_v8 = vld [vmem:[%s2567_s12 + $0xb] ss:$0 sm:$0xff] }
0x1432   :  { %v1167_v21 = vsel %vm132_vm4, %v1163_v48, 0.0 }
0x1433   :  { %1168 = vadd.xlane.f32.xlu0 %v1167_v21  ;;  %1809 = vmatpush3.bf16.msra.mxu1 %v1208_v59 }
0x1434   :  { %1810 = vmatprep.subr.bf16.mxu1 %v1960_v2 }
0x1437   :  { %1811 = vmatpush3.bf16.msra.mxu1 %v1209_v62 }
0x1438   :  { %1828 = vmatprep.subr.bf16.mxu1 %v1960_v2 }
0x14be   :  { %v1166_v50 = vpop.xlane.xlu1 %1165 }
0x14bf   :  { %v1170_v46 = vmul.f32 0.03125, %v1166_v50 }
0x14c0   :  { %v1169_v51 = vpop.xlane.xlu0 %1168 }
0x14c1   :  { %v1172_v52 = vsub.f32 %v1162_v49, %v1170_v46  ;;  %v1171_v53 = vmul.f32 0.03125, %v1169_v51 }
0x14c3   :  { %v1173_v54 = vsub.f32 %v1163_v48, %v1171_v53  ;;  %v1174_v55 = vmul.f32 %v1172_v52, %v1172_v52 }
0x14c5   :  { %v1176_v56 = vsel %vm132_vm4, %v1174_v55, 0.0  ;;  %v1175_v57 = vmul.f32 %v1173_v54, %v1173_v54 }
0x14c6   :  { %1177 = vadd.xlane.f32.xlu0 %v1176_v56 }
0x14c7   :  { %v1179_v7 = vsel %vm132_vm4, %v1175_v57, 0.0 }
0x14c8   :  { %1180 = vadd.xlane.f32.xlu1 %v1179_v7 }
0x1553   :  { %v1178_v63 = vpop.xlane.xlu0 %1177 }
0x1554   :  { %v1182_v0 = vmul.f32 0.03125, %v1178_v63 }
0x1555   :  { %v1181_v3 = vpop.xlane.xlu1 %1180 }
0x1556   :  { %v1184_v4 = vadd.f32 1e-12, %v1182_v0  ;;  %v1183_v5 = vmul.f32 0.03125, %v1181_v3 }
0x1558   :  { %1921 = vrsqrt.f32 %v1184_v4  ;;  %v1185_v6 = vadd.f32 1e-12, %v1183_v5 }
0x155a   :  { %1923 = vrsqrt.f32 %v1185_v6 }
0x1562   :  { %v1922_v9 = vpop.eup %1921 }
0x1563   :  { %v1188_v13 = vmul.f32 %v1922_v9, %v1172_v52 }
0x1564   :  { %v1924_v14 = vpop.eup %1923 }
0x1565   :  { %v1194_v15 = vmul.f32 %v1600_v10, %v1188_v13  ;;  %v1189_v16 = vmul.f32 %v1924_v14, %v1173_v54 }
0x1567   :  { %v1195_v18 = vmul.f32 %v1600_v10, %v1189_v16  ;;  %v1200_v19 = vadd.f32 %v1601_v17, %v1194_v15 }
0x1569   :  { %v2448_v20 = vadd.f32 %v1601_v17, %v1195_v18 }
0x156b   :  { %v1207_v22 = vpack.c.bf16 %v2448_v20, %v1200_v19 }
0x156d   :  { %1813 = vmatmul.mubr.msk.bf16.vlgmr.msra.gmra.mrb[32].mxu1 %vm132_vm4, %v1207_v22 }
0x156e   :  { %1830 = vmatprep.mubr.msk.bf16.mxu1 %vm1961_vm0, %v1960_v2 }
0x1640   :  { %v1255_v28 = vpop.f32.mrb[32].mxu1 }
0x1641   :  { %v1256_v37 = vadd.f32 %v1607_v36, %v1255_v28  ;;  %v1814_v38 = vpop.f32.mrb[33].mxu1 }
0x1642   :  { %v1258_v39 = vpop.f32.mrb[34].mxu1  ;;  %v1621_v38 = vsel %vm1386_vm13, 1.0, %v1960_v2 }
0x1643   :  { %v1262_v40 = vmul.f32 %v1256_v37, %v1256_v37  ;;  %v1259_v41 = vadd.f32 %v1607_v36, %v1258_v39  ;;  %v1815_v42 = vpop.f32.mrb[35].mxu1  ;;  %v1434_v39 = vld [vmem:[%s2565_s10] sm:$0xff] }
0x1644   :  { %v1439_v42 = vpack.c.bf16 %v1435_v24, %v1434_v39 }
0x1645   :  { %v1264_v43 = vmul.f32 %v1262_v40, %v1256_v37  ;;  %v1263_v45 = vmul.f32 %v1259_v41, %v1259_v41 }
0x1647   :  { %v1266_v47 = vmul.f32 0.044715, %v1264_v43  ;;  %v1265_v1 = vmul.f32 %v1263_v45, %v1259_v41  ;;  %v1437_v43 = vld [vmem:[%s2565_s10 + $0x18] sm:$0xff] }
0x1648   :  { %v1440_v45 = vpack.c.bf16 %v1437_v43, %v1436_v30 }
0x1649   :  { %v1268_v49 = vadd.f32 %v1266_v47, %v1256_v37  ;;  %v1267_v44 = vmul.f32 0.044715, %v1265_v1 }
0x164b   :  { %v1270_v48 = vmul.f32 0.7978846, %v1268_v49  ;;  %v1269_v21 = vadd.f32 %v1267_v44, %v1259_v41 }
0x164d   :  { %1925 = vtanh.f32 %v1270_v48  ;;  %v1271_v50 = vmul.f32 0.7978846, %v1269_v21  ;;  %v1490_v21 = vld [vmem:[%s2566_s11] sm:$0xff] }
0x164f   :  { %1927 = vtanh.f32 %v1271_v50  ;;  %v1491_v50 = vld [vmem:[%s2566_s11 + $0x8] sm:$0xff] }
0x1657   :  { %v1926_v46 = vpop.eup %1925 }
0x1658   :  { %v1274_v51 = vadd.f32 1.0, %v1926_v46  ;;  %v1495_v46 = vpack.c.bf16 %v1491_v50, %v1490_v21 }
0x1659   :  { %v1928_v52 = vpop.eup %1927 }
0x165a   :  { %v1276_v53 = vmul.f32 0.5, %v1274_v51  ;;  %v1275_v54 = vadd.f32 1.0, %v1928_v52  ;;  %v1492_v51 = vld [vmem:[%s2566_s11 + $0x10] sm:$0xff]  ;;  %v1493_v52 = vld [vmem:[%s2566_s11 + $0x18] sm:$0xff]  ;;  %s1970_s11 = smov [#allocation2]  }
0x165b   :  { %s1553_s3 = sshll.u32 %s1970_s11, 4  ;;  %s1554_s3 = int_to_ptr.vmem [resolvable:$true] %s1553_s3 }
0x165c   :  { %v1277_v55 = vmul.f32 0.5, %v1275_v54  ;;  %v1278_v56 = vmul.f32 %v1276_v53, %v1256_v37  ;;  %v1496_v53 = vpack.c.bf16 %v1493_v52, %v1492_v51  ;;  %v1623_v54 = vld [vmem:[%s2567_s12 + $0xe] ss:$0 sm:$0xff]  ;;  %s1935_s28 = scalar_lea.vmem %s1554_s3, 32  ;;  %p1940_p1 = scmp.lt.s32.totalorder %s1554_s3, %s1554_s3 }
0x165d   :  { %p1936_p0 = scmp.ne.s32.totalorder %s1554_s3, %s1935_s28  ;;  %p1941_p2 = scmp.lt.s32.totalorder %s1935_s28, %s1935_s28 }
0x165e   :  { %v1279_v57 = vmul.f32 %v1277_v55, %v1259_v41  ;;  %v1389_v41 = vpack.c.bf16 %v1621_v38, %v1621_v38 }
0x165f   :  { %p1942_p3 = por %p1941_p2, %p1940_p1 }
0x1660   :  { %v1289_v7 = vpack.c.bf16 %v1279_v57, %v1278_v56 }
0x1661   :  { %p1943_p4 = pnand %p1942_p3, %p1936_p0 }
0x1662   :  { %1825 = vmatmul.mubr.msk.bf16.vlgmr.msra.gmra.mrb[28].mxu0 %vm704_vm12, %v1289_v7 }
0x1663   :  { %1846 = vmatprep.mubr.msk.bf16.mxu0 %vm1961_vm0, %v1960_v2  ;;  %1843 = vmatpush3.bf16.msra.mxu0 %v1495_v46 }
0x1664   :  { %1844 = vmatprep.subr.bf16.mxu0 %v1960_v2 }
0x1667   :  { %1845 = vmatpush3.bf16.msra.mxu0 %v1496_v53 }
0x1735   :  { %v1336_v58 = vpop.f32.mrb[28].mxu0 }
0x1736   :  { %v1337_v59 = vadd.f32 %v1617_v8, %v1336_v58  ;;  %v1826_v60 = vpop.f32.mrb[29].mxu0 }
0x1737   :  { %v1339_v61 = vpop.f32.mrb[30].mxu0 }
0x1738   :  { %v1340_v62 = vadd.f32 %v1617_v8, %v1339_v61  ;;  %v1827_v63 = vpop.f32.mrb[31].mxu0  ;;  %v1345_v0 = vadd.f32 %v1337_v59, %v1200_v19  ;;  %v1625_v59 = vld [vmem:[%s2567_s12 + $0xf] ss:$0 sm:$0xff] }
0x173a   :  { %v1347_v3 = vsel %vm132_vm4, %v1345_v0, 0.0  ;;  %v1346_v4 = vadd.f32 %v1340_v62, %v2448_v20 }
0x173b   :  { %1348 = vadd.xlane.f32.xlu0 %v1347_v3 }
0x173c   :  { %v1350_v5 = vsel %vm132_vm4, %v1346_v4, 0.0 }
0x173d   :  { %1351 = vadd.xlane.f32.xlu1 %v1350_v5 }
0x17c8   :  { %v1349_v6 = vpop.xlane.xlu0 %1348 }
0x17c9   :  { %v1353_v9 = vmul.f32 0.03125, %v1349_v6 }
0x17ca   :  { %v1352_v10 = vpop.xlane.xlu1 %1351 }
0x17cb   :  { %v1355_v13 = vsub.f32 %v1345_v0, %v1353_v9  ;;  %v1354_v14 = vmul.f32 0.03125, %v1352_v10 }
0x17cd   :  { %v1356_v15 = vsub.f32 %v1346_v4, %v1354_v14  ;;  %v1357_v16 = vmul.f32 %v1355_v13, %v1355_v13 }
0x17cf   :  { %v1359_v17 = vsel %vm132_vm4, %v1357_v16, 0.0  ;;  %v1358_v18 = vmul.f32 %v1356_v15, %v1356_v15 }
0x17d0   :  { %1360 = vadd.xlane.f32.xlu0 %v1359_v17 }
0x17d1   :  { %v1362_v19 = vsel %vm132_vm4, %v1358_v18, 0.0 }
0x17d2   :  { %1363 = vadd.xlane.f32.xlu1 %v1362_v19 }
0x185d   :  { %v1361_v22 = vpop.xlane.xlu0 %1360 }
0x185e   :  { %v1365_v20 = vmul.f32 0.03125, %v1361_v22 }
0x185f   :  { %v1364_v23 = vpop.xlane.xlu1 %1363 }
0x1860   :  { %v1367_v25 = vadd.f32 1e-12, %v1365_v20  ;;  %v1366_v11 = vmul.f32 0.03125, %v1364_v23 }
0x1862   :  { %1929 = vrsqrt.f32 %v1367_v25  ;;  %v1368_v12 = vadd.f32 1e-12, %v1366_v11 }
0x1864   :  { %1931 = vrsqrt.f32 %v1368_v12 }
0x186c   :  { %v1930_v26 = vpop.eup %1929 }
0x186d   :  { %v1371_v31 = vmul.f32 %v1930_v26, %v1355_v13 }
0x186e   :  { %v1932_v32 = vpop.eup %1931 }
0x186f   :  { %v1372_v33 = vmul.f32 %v1932_v32, %v1356_v15  ;;  %v1377_v34 = vmul.f32 %v1619_v27, %v1371_v31 }
0x1871   :  { %v1378_v36 = vmul.f32 %v1619_v27, %v1372_v33  ;;  %v1383_v28 = vadd.f32 %v1620_v35, %v1377_v34 }
0x1873   :  { %v1384_v37 = vadd.f32 %v1620_v35, %v1378_v36 }
0x1875   :  { %v1390_v40 = vpack.c.bf16 %v1384_v37, %v1383_v28 }
0x1877   :  { %1829 = vmatpush3.bf16.msra.mxu1 %v1390_v40 }
0x1878   :  { %1834 = vmatprep.subr.bf16.mxu1 %v1960_v2 }
0x187a   :  { %1831 = vmatmul.mubr.msk.bf16.vlgmr.msra.gmra.mrb[36].mxu1 %vm263_vm5, %v1389_v41 }
0x187b   :  { %1835 = vmatpush3.bf16.msra.mxu1 %v1439_v42  ;;  %1838 = vmatprep.mubr.msk.bf16.mxu1 %vm1961_vm0, %v1960_v2 }
0x187c   :  { %1836 = vmatprep.subr.bf16.mxu1 %v1960_v2 }
0x187f   :  { %1837 = vmatpush3.bf16.msra.mxu1 %v1440_v45 }
0x194d   :  { %v1428_v47 = vpop.f32.mrb[36].mxu1 }
0x194e   :  { %v1438_v1 = vpack.c.bf16 %v1428_v47, %v1428_v47  ;;  %v1832_v49 = vpop.f32.mrb[37].mxu1 }
0x194f   :  { %v1431_v44 = vpop.f32.mrb[38].mxu1 }
0x1950   :  { %v1833_v48 = vpop.f32.mrb[39].mxu1  ;;  %1839 = vmatmul.mubr.msk.bf16.vlgmr.msra.gmra.mrb[40].mxu1 %vm132_vm4, %v1438_v1 }
0x1a23   :  { %v1483_v55 = vpop.f32.mrb[40].mxu1 }
0x1a24   :  { %v1484_v56 = vadd.f32 %v1623_v54, %v1483_v55  ;;  %v1840_v57 = vpop.f32.mrb[41].mxu1 }
0x1a25   :  { %v1486_v7 = vpop.f32.mrb[42].mxu1 }
0x1a26   :  { %1933 = vtanh.f32 %v1484_v56  ;;  %v1841_v2 = vpop.f32.mrb[43].mxu1 }
0x1a30   :  { %v1934_v8 = vpop.eup %1933 }
0x1a31   :  { %v1494_v58 = vpack.c.bf16 %v1934_v8, %v1934_v8 }
0x1a33   :  { %1847 = vmatmul.mubr.msk.bf16.vlgmr.msra.gmra.mrb[32].mxu0 %vm132_vm4, %v1494_v58 }
0x1b06   :  { %v1539_v60 = vpop.f32.mrb[32].mxu0 }
0x1b07   :  { %v1540_v61 = vadd.f32 %v1625_v59, %v1539_v60  ;;  %v1848_v62 = vpop.f32.mrb[33].mxu0 }
0x1b08   :  { %v1542_v63 = vpop.f32.mrb[34].mxu0 }
0x1b09   :  { %v1849_v0 = vpop.f32.mrb[35].mxu0  ;;  %1546 = vst.msk [vmem:[#allocation2] sm:$0x3] %vm1545_vm14, %v1540_v61 }
0x1b0a   :  { %1946 = shalt.err (!%p1943_p4)
}
0x1b0b   :  { %s1947_s12 = scalar_lea.hbm %s2568_s13, 32 }
0x1b0c   :  { %p1948_p5 = scmp.ne.s32.totalorder %s2568_s13, %s1947_s12  ;;  %p1951_p6 = scmp.lt.u32.totalorder %s1947_s12, %s2568_s13 }
0x1b0e   :  { %p1953_p7 = pnand %p1951_p6, %p1948_p5 }
0x1b10   :  { %1956 = shalt.err (!%p1953_p7)
}
0x1b11   :  { %1556 = dma.vmem_to_hbm [thread:$0]  %s1554_s3, 32, %s2568_s13, [#allocation3]  }
0x1b12   :  { %1957 = dma.done.wait [#allocation3], 32  }
0x1b13   :  { %1958 = vsyncadd [#allocation3], 4294967264 }
0x1b14   :  { %1560 = vsyncpa [#allocation3], 1 }

</bundles_post_ra>
